<compile_context>
chip_gen: v6e
topology: v6e:2x2x1
jax: 0.10.0
libtpu: 0.0.40
codegen_flags: <defaults>
</compile_context>

<pallas_src>
import jax
import jax.numpy as jnp
from jax.experimental import pallas as pl
from jax.experimental.pallas import tpu as pltpu

D = 32          # config.title_emb_dim
VOCAB = 64      # config.title_tokenizer.vocab_size (synthetic)
FILTER = 3
PAD = FILTER - 1
N_CONV = 4
LANES = 128     # im2col contraction / output slab width (full lane tile)
COS_EPS = 1e-8  # torch cosine-similarity default eps


# --------------------------------------------------------------------------
# Fused kernel: whole PageRanker training forward, VMEM-resident, gridless.
# --------------------------------------------------------------------------
def _page_ranker_fused_kernel(tok_ref, emb_ref, cw_ref, cb_ref, tw_ref, tb_ref,
                              qraw_ref, cand_ref, out_ref):
    B, n_cand, Dd = cand_ref.shape
    BL = tok_ref.shape[0]
    L = BL // B
    vocab = emb_ref.shape[0]

    # --- fused embedding gather: one-hot @ table on the MXU (no dynamic gather) ---
    tok = tok_ref[...]                                                    # (B*L, 1) i32
    onehot = (jax.lax.broadcasted_iota(jnp.int32, (BL, vocab), 1)
              == tok).astype(jnp.float32)                                 # (B*L, V)
    x = jnp.dot(onehot, emb_ref[...].astype(jnp.float32),
                preferred_element_type=jnp.float32)                       # (B*L, D)
    x = x.reshape(B, L, Dd)

    # --- ContextEncoder conv stack: Conv1d(k=3, pad=2)+ReLU (+MaxPool1d(2,2)) ---
    for l in range(N_CONV):
        l_in = x.shape[1]
        l_out = l_in + 2 * PAD - FILTER + 1                               # = l_in + 2
        zt = jnp.zeros((B, PAD, Dd), jnp.float32)
        xp = jnp.concatenate([zt, x, zt], axis=1)                         # (B, l_in+4, D)
        lane_pad = jnp.zeros((B, l_out, LANES - FILTER * Dd), jnp.float32)
        # im2col: 3 shifted windows + zero lanes -> one lane-aligned 128-wide slab
        xcat = jnp.concatenate(
            [xp[:, k:k + l_out, :] for k in range(FILTER)] + [lane_pad],
            axis=2)                                                       # (B, l_out, 128)
        y = jnp.dot(xcat.reshape(B * l_out, LANES), cw_ref[l],
                    preferred_element_type=jnp.float32) + cb_ref[l]       # (B*l_out, D)
        y = jnp.maximum(y, 0.0).reshape(B, l_out, Dd)                     # ReLU
        if l <= 2:                                                        # MaxPool1d(2, 2)
            lh = l_out // 2
            y = jnp.max(y[:, :2 * lh, :].reshape(B, lh, 2, Dd), axis=2)   # (B, lh, D)
        x = y

    # --- max over time + trans_layer (Linear) + Tanh ---
    pooled = jnp.max(x, axis=1)                                           # (B, D)
    ctx = jnp.tanh(jnp.dot(pooled, tw_ref[...],
                           preferred_element_type=jnp.float32) + tb_ref[...])

    # --- PageRanker head: query*context -> cosine sim vs candidates -> InfoNCE ---
    # TODO(synk): nn.Dropout(0.25) runs in training mode in the reference; here it
    # is the eval-mode identity (no stochastic mask).
    q = qraw_ref[...].astype(jnp.float32) * ctx                           # (B, D)
    c = cand_ref[...].astype(jnp.float32)                                 # (B, N, D)
    qn = q * jax.lax.rsqrt(
        jnp.maximum(jnp.sum(q * q, axis=1, keepdims=True), COS_EPS * COS_EPS))
    cn = c * jax.lax.rsqrt(
        jnp.maximum(jnp.sum(c * c, axis=2, keepdims=True), COS_EPS * COS_EPS))
    dis = jnp.sum(qn[:, None, :] * cn, axis=2)                            # (B, N)
    num = jnp.exp(dis[:, 0:1])                                            # p_dis
    den = jnp.sum(jnp.exp(dis[:, 1:]), axis=1, keepdims=True) + num       # + n_dis
    loss = -jnp.log(num / den)                                            # (B, 1)

    # single lane-dense (B, 128) output slab: [dis | loss | qemb | zero-pad]
    slab_pad = jnp.zeros((B, LANES - n_cand - 1 - Dd), jnp.float32)
    out_ref[...] = jnp.concatenate([dis, loss, q, slab_pad], axis=1)


# --------------------------------------------------------------------------
# One-time parameter packing (hoisted out of the forward).
# --------------------------------------------------------------------------
def prepare_params(params):
    # PyTorch Conv1d weight (D_out, D_in, K) -> im2col (K*D_in, D_out), zero-padded
    # to a full 128-lane contraction: W[k*D_in + i, o] = w[o, i, k].
    cw = []
    for l in range(N_CONV):
        w = jnp.transpose(params[f"conv{l}_w"], (2, 1, 0)).reshape(FILTER * D, D)
        cw.append(jnp.pad(w, ((0, LANES - FILTER * D), (0, 0))))
    cw = jnp.stack(cw, axis=0)                                            # (4, 128, D)
    cb = jnp.stack([params[f"conv{l}_b"].reshape(1, D) for l in range(N_CONV)], axis=0)
    return {
        "embed": params["embed"].astype(jnp.float32),                     # (V, D)
        "conv_w": cw,                                                     # (4, 128, D)
        "conv_b": cb,                                                     # (4, 1, D)
        "trans_w_t": params["trans_w"].T,                                 # (D_in, D_out)
        "trans_b": params["trans_b"].reshape(1, D),                       # (1, D)
    }


@jax.jit
def page_ranker_forward(prepped, context_tokens, query_emb_raw, cand_emb):
    """Training-path PageRanker.forward -> (dis_final, loss, query_embedding)."""
    B, L = context_tokens.shape
    n_cand, d = cand_emb.shape[1], cand_emb.shape[2]
    assert n_cand + 1 + d <= LANES
    tok = context_tokens.reshape(B * L, 1).astype(jnp.int32)

    vm = pl.BlockSpec(memory_space=pltpu.MemorySpace.VMEM)
    # TODO(synk): for a real (large) batch, add a "parallel" batch grid axis so the
    # second TensorCore on v7x is used; at B=2 a gridless single call is optimal.
    out = pl.pallas_call(
        _page_ranker_fused_kernel,
        out_shape=jax.ShapeDtypeStruct((B, LANES), jnp.float32),
        in_specs=[vm] * 8,
        out_specs=vm,
    )(tok, prepped["embed"], prepped["conv_w"], prepped["conv_b"],
      prepped["trans_w_t"], prepped["trans_b"], query_emb_raw, cand_emb)

    dis = out[:, :n_cand]
    loss = out[:, n_cand]
    qemb = out[:, n_cand + 1:n_cand + 1 + d]
    return dis, loss, qemb


# --------------------------------------------------------------------------
# Pure-JAX reference (NCL, mirrors the PyTorch module) for numerical checking.
# --------------------------------------------------------------------------
def _reference_forward(params, context_tokens, query_emb_raw, cand_emb):
    x = params["embed"][context_tokens]                                   # (B, L, D)
    x = jnp.transpose(x, (0, 2, 1))                                       # (B, D, L)
    for l in range(N_CONV):
        w, b = params[f"conv{l}_w"], params[f"conv{l}_b"]
        xp = jnp.pad(x, ((0, 0), (0, 0), (PAD, PAD)))
        l_out = x.shape[2] + 2 * PAD - FILTER + 1
        y = b[None, :, None] + sum(
            jnp.einsum("oi,bil->bol", w[:, :, k], xp[:, :, k:k + l_out])
            for k in range(FILTER))
        y = jnp.maximum(y, 0.0)
        if l <= 2:
            lh = y.shape[2] // 2
            y = jnp.maximum(y[:, :, 0:2 * lh:2], y[:, :, 1:2 * lh:2])
        x = y
    pooled = jnp.max(x, axis=2)
    ctx = jnp.tanh(pooled @ params["trans_w"].T + params["trans_b"])
    q = query_emb_raw * ctx
    qn = q / jnp.maximum(jnp.linalg.norm(q, axis=1, keepdims=True), COS_EPS)
    cn = cand_emb / jnp.maximum(jnp.linalg.norm(cand_emb, axis=2, keepdims=True), COS_EPS)
    dis = jnp.einsum("bd,bnd->bn", qn, cn)
    num = jnp.exp(dis[:, 0])
    den = jnp.sum(jnp.exp(dis[:, 1:]), axis=1) + num
    return dis, -jnp.log(num / den), q


if __name__ == "__main__":
    key = jax.random.PRNGKey(0)
    B, L, N = 2, 8, 8                                    # batch, context seq len, candidates

    ks = jax.random.split(key, 12)
    params = {
        "embed": 0.1 * jax.random.normal(ks[0], (VOCAB, D), jnp.float32),
        "trans_w": 0.1 * jax.random.normal(ks[1], (D, D), jnp.float32),
        "trans_b": 0.1 * jax.random.normal(ks[2], (D,), jnp.float32),
    }
    for l in range(N_CONV):
        params[f"conv{l}_w"] = 0.1 * jax.random.normal(ks[3 + l], (D, D, FILTER), jnp.float32)
        params[f"conv{l}_b"] = 0.1 * jax.random.normal(ks[7 + l], (D,), jnp.float32)

    # Context titles as token ids; query / candidate embeddings stand in for the
    # external `title_encoder` outputs (its architecture is not given in the module).
    context_tokens = jax.random.randint(ks[11], (B, L), 0, VOCAB)
    kq, kc = jax.random.split(jax.random.fold_in(key, 123))
    query_emb_raw = jax.random.normal(kq, (B, D), jnp.float32)
    cand_emb = jax.random.normal(kc, (B, N, D), jnp.float32)

    prepped = prepare_params(params)
    dis_final, loss, query_embedding = page_ranker_forward(
        prepped, context_tokens, query_emb_raw, cand_emb)
    jax.block_until_ready((dis_final, loss, query_embedding))

    assert dis_final.shape == (B, N)
    assert loss.shape == (B,)
    assert query_embedding.shape == (B, D)

    # Numerical check against the pure-JAX reference of the same forward.
    dis_r, loss_r, q_r = _reference_forward(params, context_tokens, query_emb_raw, cand_emb)
    for got, want in ((dis_final, dis_r), (loss, loss_r), (query_embedding, q_r)):
        assert float(jnp.max(jnp.abs(got - want))) < 1e-3, "mismatch vs reference"

    print("KERNEL_OK")
</pallas_src>

<mosaic_0001>
module attributes {stable_mosaic.version = 11 : i64} {
  func.func @_page_ranker_fused_kernel(%arg0: memref<16x1xi32, #tpu.memory_space<vmem>>, %arg1: memref<64x32xf32, #tpu.memory_space<vmem>>, %arg2: memref<4x128x32xf32, #tpu.memory_space<vmem>>, %arg3: memref<4x1x32xf32, #tpu.memory_space<vmem>>, %arg4: memref<32x32xf32, #tpu.memory_space<vmem>>, %arg5: memref<1x32xf32, #tpu.memory_space<vmem>>, %arg6: memref<2x32xf32, #tpu.memory_space<vmem>>, %arg7: memref<2x8x32xf32, #tpu.memory_space<vmem>>, %arg8: memref<2x128xf32, #tpu.memory_space<vmem>>) attributes {dimension_semantics = [], scalar_prefetch = 0 : i64, scratch_operands = 0 : i64, tpu.core_type = #tpu.core_type<tc>} {
    %c0 = arith.constant 0 : index
    %c0_0 = arith.constant 0 : index
    %0 = vector.load %arg0[%c0, %c0_0] : memref<16x1xi32, #tpu.memory_space<vmem>>, vector<16x1xi32>
    %1 = tpu.iota {dimensions = array<i32: 1>} : vector<16x64xi32>
    %2 = vector.broadcast %0 : vector<16x1xi32> to vector<16x64xi32>
    %3 = arith.cmpi eq, %1, %2 : vector<16x64xi32>
    %4 = arith.extui %3 : vector<16x64xi1> to vector<16x64xi32>
    %5 = arith.sitofp %4 : vector<16x64xi32> to vector<16x64xf32>
    %c0_1 = arith.constant 0 : index
    %c0_2 = arith.constant 0 : index
    %6 = vector.load %arg1[%c0_1, %c0_2] : memref<64x32xf32, #tpu.memory_space<vmem>>, vector<64x32xf32>
    %cst = arith.constant dense<0.000000e+00> : vector<16x32xf32>
    %7 = tpu.matmul %5, %6, %cst {dimension_numbers = #tpu.dot_dimension_numbers<[1], [0], [0], [1], [0, 0, 1, 1], [], []>} : vector<16x64xf32>, vector<64x32xf32>, vector<16x32xf32> -> vector<16x32xf32>
    %8 = vector.shape_cast %7 : vector<16x32xf32> to vector<2x8x32xf32>
    %cst_3 = arith.constant 0.000000e+00 : f32
    %9 = vector.broadcast %cst_3 : f32 to vector<2x2x32xf32>
    %10 = tpu.concatenate %9, %8, %9 in 1 : vector<2x2x32xf32>, vector<2x8x32xf32>, vector<2x2x32xf32> -> vector<2x12x32xf32>
    %cst_4 = arith.constant 0.000000e+00 : f32
    %11 = vector.broadcast %cst_4 : f32 to vector<2x10x32xf32>
    %12 = vector.extract_strided_slice %10 {offsets = [0, 0, 0], sizes = [2, 10, 32], strides = [1, 1, 1]} : vector<2x12x32xf32> to vector<2x10x32xf32>
    %13 = vector.extract_strided_slice %10 {offsets = [0, 1, 0], sizes = [2, 10, 32], strides = [1, 1, 1]} : vector<2x12x32xf32> to vector<2x10x32xf32>
    %14 = vector.extract_strided_slice %10 {offsets = [0, 2, 0], sizes = [2, 10, 32], strides = [1, 1, 1]} : vector<2x12x32xf32> to vector<2x10x32xf32>
    %15 = tpu.concatenate %12, %13, %14, %11 in 2 : vector<2x10x32xf32>, vector<2x10x32xf32>, vector<2x10x32xf32>, vector<2x10x32xf32> -> vector<2x10x128xf32>
    %16 = vector.shape_cast %15 : vector<2x10x128xf32> to vector<20x128xf32>
    %c0_5 = arith.constant 0 : index
    %c0_6 = arith.constant 0 : index
    %c0_7 = arith.constant 0 : index
    %17 = vector.load %arg2[%c0_5, %c0_6, %c0_7] : memref<4x128x32xf32, #tpu.memory_space<vmem>>, vector<1x128x32xf32>
    %18 = vector.shape_cast %17 : vector<1x128x32xf32> to vector<128x32xf32>
    %cst_8 = arith.constant dense<0.000000e+00> : vector<20x32xf32>
    %19 = tpu.matmul %16, %18, %cst_8 {dimension_numbers = #tpu.dot_dimension_numbers<[1], [0], [0], [1], [0, 0, 1, 1], [], []>} : vector<20x128xf32>, vector<128x32xf32>, vector<20x32xf32> -> vector<20x32xf32>
    %c0_9 = arith.constant 0 : index
    %c0_10 = arith.constant 0 : index
    %c0_11 = arith.constant 0 : index
    %20 = vector.load %arg3[%c0_9, %c0_10, %c0_11] : memref<4x1x32xf32, #tpu.memory_space<vmem>>, vector<1x1x32xf32>
    %21 = vector.shape_cast %20 : vector<1x1x32xf32> to vector<1x32xf32>
    %22 = vector.broadcast %21 : vector<1x32xf32> to vector<20x32xf32>
    %23 = arith.addf %19, %22 : vector<20x32xf32>
    %cst_12 = arith.constant 0.000000e+00 : f32
    %24 = vector.broadcast %cst_12 : f32 to vector<20x32xf32>
    %25 = arith.maximumf %23, %24 : vector<20x32xf32>
    %26 = vector.shape_cast %25 : vector<20x32xf32> to vector<2x10x32xf32>
    %27 = vector.shape_cast %26 : vector<2x10x32xf32> to vector<2x5x2x32xf32>
    %cst_13 = arith.constant dense<0xFF800000> : vector<2x5x32xf32>
    %28 = vector.multi_reduction <maximumf>, %27, %cst_13 [2] : vector<2x5x2x32xf32> to vector<2x5x32xf32>
    %cst_14 = arith.constant 0.000000e+00 : f32
    %29 = vector.broadcast %cst_14 : f32 to vector<2x2x32xf32>
    %30 = tpu.concatenate %29, %28, %29 in 1 : vector<2x2x32xf32>, vector<2x5x32xf32>, vector<2x2x32xf32> -> vector<2x9x32xf32>
    %cst_15 = arith.constant 0.000000e+00 : f32
    %31 = vector.broadcast %cst_15 : f32 to vector<2x7x32xf32>
    %32 = vector.extract_strided_slice %30 {offsets = [0, 0, 0], sizes = [2, 7, 32], strides = [1, 1, 1]} : vector<2x9x32xf32> to vector<2x7x32xf32>
    %33 = vector.extract_strided_slice %30 {offsets = [0, 1, 0], sizes = [2, 7, 32], strides = [1, 1, 1]} : vector<2x9x32xf32> to vector<2x7x32xf32>
    %34 = vector.extract_strided_slice %30 {offsets = [0, 2, 0], sizes = [2, 7, 32], strides = [1, 1, 1]} : vector<2x9x32xf32> to vector<2x7x32xf32>
    %35 = tpu.concatenate %32, %33, %34, %31 in 2 : vector<2x7x32xf32>, vector<2x7x32xf32>, vector<2x7x32xf32>, vector<2x7x32xf32> -> vector<2x7x128xf32>
    %36 = vector.shape_cast %35 : vector<2x7x128xf32> to vector<14x128xf32>
    %c1 = arith.constant 1 : index
    %c0_16 = arith.constant 0 : index
    %c0_17 = arith.constant 0 : index
    %37 = vector.load %arg2[%c1, %c0_16, %c0_17] : memref<4x128x32xf32, #tpu.memory_space<vmem>>, vector<1x128x32xf32>
    %38 = vector.shape_cast %37 : vector<1x128x32xf32> to vector<128x32xf32>
    %cst_18 = arith.constant dense<0.000000e+00> : vector<14x32xf32>
    %39 = tpu.matmul %36, %38, %cst_18 {dimension_numbers = #tpu.dot_dimension_numbers<[1], [0], [0], [1], [0, 0, 1, 1], [], []>} : vector<14x128xf32>, vector<128x32xf32>, vector<14x32xf32> -> vector<14x32xf32>
    %c1_19 = arith.constant 1 : index
    %c0_20 = arith.constant 0 : index
    %c0_21 = arith.constant 0 : index
    %40 = vector.load %arg3[%c1_19, %c0_20, %c0_21] : memref<4x1x32xf32, #tpu.memory_space<vmem>>, vector<1x1x32xf32>
    %41 = vector.shape_cast %40 : vector<1x1x32xf32> to vector<1x32xf32>
    %42 = vector.broadcast %41 : vector<1x32xf32> to vector<14x32xf32>
    %43 = arith.addf %39, %42 : vector<14x32xf32>
    %cst_22 = arith.constant 0.000000e+00 : f32
    %44 = vector.broadcast %cst_22 : f32 to vector<14x32xf32>
    %45 = arith.maximumf %43, %44 : vector<14x32xf32>
    %46 = vector.shape_cast %45 : vector<14x32xf32> to vector<2x7x32xf32>
    %47 = vector.extract_strided_slice %46 {offsets = [0, 0, 0], sizes = [2, 6, 32], strides = [1, 1, 1]} : vector<2x7x32xf32> to vector<2x6x32xf32>
    %48 = vector.shape_cast %47 : vector<2x6x32xf32> to vector<2x3x2x32xf32>
    %cst_23 = arith.constant dense<0xFF800000> : vector<2x3x32xf32>
    %49 = vector.multi_reduction <maximumf>, %48, %cst_23 [2] : vector<2x3x2x32xf32> to vector<2x3x32xf32>
    %cst_24 = arith.constant 0.000000e+00 : f32
    %50 = vector.broadcast %cst_24 : f32 to vector<2x2x32xf32>
    %51 = tpu.concatenate %50, %49, %50 in 1 : vector<2x2x32xf32>, vector<2x3x32xf32>, vector<2x2x32xf32> -> vector<2x7x32xf32>
    %cst_25 = arith.constant 0.000000e+00 : f32
    %52 = vector.broadcast %cst_25 : f32 to vector<2x5x32xf32>
    %53 = vector.extract_strided_slice %51 {offsets = [0, 0, 0], sizes = [2, 5, 32], strides = [1, 1, 1]} : vector<2x7x32xf32> to vector<2x5x32xf32>
    %54 = vector.extract_strided_slice %51 {offsets = [0, 1, 0], sizes = [2, 5, 32], strides = [1, 1, 1]} : vector<2x7x32xf32> to vector<2x5x32xf32>
    %55 = vector.extract_strided_slice %51 {offsets = [0, 2, 0], sizes = [2, 5, 32], strides = [1, 1, 1]} : vector<2x7x32xf32> to vector<2x5x32xf32>
    %56 = tpu.concatenate %53, %54, %55, %52 in 2 : vector<2x5x32xf32>, vector<2x5x32xf32>, vector<2x5x32xf32>, vector<2x5x32xf32> -> vector<2x5x128xf32>
    %57 = vector.shape_cast %56 : vector<2x5x128xf32> to vector<10x128xf32>
    %c2 = arith.constant 2 : index
    %c0_26 = arith.constant 0 : index
    %c0_27 = arith.constant 0 : index
    %58 = vector.load %arg2[%c2, %c0_26, %c0_27] : memref<4x128x32xf32, #tpu.memory_space<vmem>>, vector<1x128x32xf32>
    %59 = vector.shape_cast %58 : vector<1x128x32xf32> to vector<128x32xf32>
    %cst_28 = arith.constant dense<0.000000e+00> : vector<10x32xf32>
    %60 = tpu.matmul %57, %59, %cst_28 {dimension_numbers = #tpu.dot_dimension_numbers<[1], [0], [0], [1], [0, 0, 1, 1], [], []>} : vector<10x128xf32>, vector<128x32xf32>, vector<10x32xf32> -> vector<10x32xf32>
    %c2_29 = arith.constant 2 : index
    %c0_30 = arith.constant 0 : index
    %c0_31 = arith.constant 0 : index
    %61 = vector.load %arg3[%c2_29, %c0_30, %c0_31] : memref<4x1x32xf32, #tpu.memory_space<vmem>>, vector<1x1x32xf32>
    %62 = vector.shape_cast %61 : vector<1x1x32xf32> to vector<1x32xf32>
    %63 = vector.broadcast %62 : vector<1x32xf32> to vector<10x32xf32>
    %64 = arith.addf %60, %63 : vector<10x32xf32>
    %cst_32 = arith.constant 0.000000e+00 : f32
    %65 = vector.broadcast %cst_32 : f32 to vector<10x32xf32>
    %66 = arith.maximumf %64, %65 : vector<10x32xf32>
    %67 = vector.shape_cast %66 : vector<10x32xf32> to vector<2x5x32xf32>
    %68 = vector.extract_strided_slice %67 {offsets = [0, 0, 0], sizes = [2, 4, 32], strides = [1, 1, 1]} : vector<2x5x32xf32> to vector<2x4x32xf32>
    %69 = vector.shape_cast %68 : vector<2x4x32xf32> to vector<2x2x2x32xf32>
    %cst_33 = arith.constant dense<0xFF800000> : vector<2x2x32xf32>
    %70 = vector.multi_reduction <maximumf>, %69, %cst_33 [2] : vector<2x2x2x32xf32> to vector<2x2x32xf32>
    %cst_34 = arith.constant 0.000000e+00 : f32
    %71 = vector.broadcast %cst_34 : f32 to vector<2x2x32xf32>
    %72 = tpu.concatenate %71, %70, %71 in 1 : vector<2x2x32xf32>, vector<2x2x32xf32>, vector<2x2x32xf32> -> vector<2x6x32xf32>
    %cst_35 = arith.constant 0.000000e+00 : f32
    %73 = vector.broadcast %cst_35 : f32 to vector<2x4x32xf32>
    %74 = vector.extract_strided_slice %72 {offsets = [0, 0, 0], sizes = [2, 4, 32], strides = [1, 1, 1]} : vector<2x6x32xf32> to vector<2x4x32xf32>
    %75 = vector.extract_strided_slice %72 {offsets = [0, 1, 0], sizes = [2, 4, 32], strides = [1, 1, 1]} : vector<2x6x32xf32> to vector<2x4x32xf32>
    %76 = vector.extract_strided_slice %72 {offsets = [0, 2, 0], sizes = [2, 4, 32], strides = [1, 1, 1]} : vector<2x6x32xf32> to vector<2x4x32xf32>
    %77 = tpu.concatenate %74, %75, %76, %73 in 2 : vector<2x4x32xf32>, vector<2x4x32xf32>, vector<2x4x32xf32>, vector<2x4x32xf32> -> vector<2x4x128xf32>
    %78 = vector.shape_cast %77 : vector<2x4x128xf32> to vector<8x128xf32>
    %c3 = arith.constant 3 : index
    %c0_36 = arith.constant 0 : index
    %c0_37 = arith.constant 0 : index
    %79 = vector.load %arg2[%c3, %c0_36, %c0_37] : memref<4x128x32xf32, #tpu.memory_space<vmem>>, vector<1x128x32xf32>
    %80 = vector.shape_cast %79 : vector<1x128x32xf32> to vector<128x32xf32>
    %cst_38 = arith.constant dense<0.000000e+00> : vector<8x32xf32>
    %81 = tpu.matmul %78, %80, %cst_38 {dimension_numbers = #tpu.dot_dimension_numbers<[1], [0], [0], [1], [0, 0, 1, 1], [], []>} : vector<8x128xf32>, vector<128x32xf32>, vector<8x32xf32> -> vector<8x32xf32>
    %c3_39 = arith.constant 3 : index
    %c0_40 = arith.constant 0 : index
    %c0_41 = arith.constant 0 : index
    %82 = vector.load %arg3[%c3_39, %c0_40, %c0_41] : memref<4x1x32xf32, #tpu.memory_space<vmem>>, vector<1x1x32xf32>
    %83 = vector.shape_cast %82 : vector<1x1x32xf32> to vector<1x32xf32>
    %84 = vector.broadcast %83 : vector<1x32xf32> to vector<8x32xf32>
    %85 = arith.addf %81, %84 : vector<8x32xf32>
    %cst_42 = arith.constant 0.000000e+00 : f32
    %86 = vector.broadcast %cst_42 : f32 to vector<8x32xf32>
    %87 = arith.maximumf %85, %86 : vector<8x32xf32>
    %88 = vector.shape_cast %87 : vector<8x32xf32> to vector<2x4x32xf32>
    %cst_43 = arith.constant dense<0xFF800000> : vector<2x32xf32>
    %89 = vector.multi_reduction <maximumf>, %88, %cst_43 [1] : vector<2x4x32xf32> to vector<2x32xf32>
    %c0_44 = arith.constant 0 : index
    %c0_45 = arith.constant 0 : index
    %90 = vector.load %arg4[%c0_44, %c0_45] : memref<32x32xf32, #tpu.memory_space<vmem>>, vector<32x32xf32>
    %cst_46 = arith.constant dense<0.000000e+00> : vector<2x32xf32>
    %91 = tpu.matmul %89, %90, %cst_46 {dimension_numbers = #tpu.dot_dimension_numbers<[1], [0], [0], [1], [0, 0, 1, 1], [], []>} : vector<2x32xf32>, vector<32x32xf32>, vector<2x32xf32> -> vector<2x32xf32>
    %c0_47 = arith.constant 0 : index
    %c0_48 = arith.constant 0 : index
    %92 = vector.load %arg5[%c0_47, %c0_48] : memref<1x32xf32, #tpu.memory_space<vmem>>, vector<1x32xf32>
    %93 = vector.broadcast %92 : vector<1x32xf32> to vector<2x32xf32>
    %94 = arith.addf %91, %93 : vector<2x32xf32>
    %95 = math.tanh %94 : vector<2x32xf32>
    %c0_49 = arith.constant 0 : index
    %c0_50 = arith.constant 0 : index
    %96 = vector.load %arg6[%c0_49, %c0_50] : memref<2x32xf32, #tpu.memory_space<vmem>>, vector<2x32xf32>
    %97 = arith.mulf %96, %95 : vector<2x32xf32>
    %c0_51 = arith.constant 0 : index
    %c0_52 = arith.constant 0 : index
    %c0_53 = arith.constant 0 : index
    %98 = vector.load %arg7[%c0_51, %c0_52, %c0_53] : memref<2x8x32xf32, #tpu.memory_space<vmem>>, vector<2x8x32xf32>
    %99 = arith.mulf %97, %97 : vector<2x32xf32>
    %cst_54 = arith.constant dense<0.000000e+00> : vector<2xf32>
    %100 = vector.multi_reduction <add>, %99, %cst_54 [1] : vector<2x32xf32> to vector<2xf32>
    %101 = vector.shape_cast %100 : vector<2xf32> to vector<2x1xf32>
    %cst_55 = arith.constant 1.000000e-16 : f32
    %102 = vector.broadcast %cst_55 : f32 to vector<2x1xf32>
    %103 = arith.maximumf %101, %102 : vector<2x1xf32>
    %104 = math.rsqrt %103 : vector<2x1xf32>
    %105 = vector.broadcast %104 : vector<2x1xf32> to vector<2x32xf32>
    %106 = arith.mulf %97, %105 : vector<2x32xf32>
    %107 = arith.mulf %98, %98 : vector<2x8x32xf32>
    %cst_56 = arith.constant dense<0.000000e+00> : vector<2x8xf32>
    %108 = vector.multi_reduction <add>, %107, %cst_56 [2] : vector<2x8x32xf32> to vector<2x8xf32>
    %109 = vector.shape_cast %108 : vector<2x8xf32> to vector<2x8x1xf32>
    %cst_57 = arith.constant 1.000000e-16 : f32
    %110 = vector.broadcast %cst_57 : f32 to vector<2x8x1xf32>
    %111 = arith.maximumf %109, %110 : vector<2x8x1xf32>
    %112 = math.rsqrt %111 : vector<2x8x1xf32>
    %113 = vector.broadcast %112 : vector<2x8x1xf32> to vector<2x8x32xf32>
    %114 = arith.mulf %98, %113 : vector<2x8x32xf32>
    %115 = vector.shape_cast %106 : vector<2x32xf32> to vector<2x1x32xf32>
    %116 = vector.broadcast %115 : vector<2x1x32xf32> to vector<2x8x32xf32>
    %117 = arith.mulf %116, %114 : vector<2x8x32xf32>
    %cst_58 = arith.constant dense<0.000000e+00> : vector<2x8xf32>
    %118 = vector.multi_reduction <add>, %117, %cst_58 [2] : vector<2x8x32xf32> to vector<2x8xf32>
    %119 = vector.extract_strided_slice %118 {offsets = [0, 0], sizes = [2, 1], strides = [1, 1]} : vector<2x8xf32> to vector<2x1xf32>
    %120 = math.exp %119 : vector<2x1xf32>
    %121 = vector.extract_strided_slice %118 {offsets = [0, 1], sizes = [2, 7], strides = [1, 1]} : vector<2x8xf32> to vector<2x7xf32>
    %122 = math.exp %121 : vector<2x7xf32>
    %cst_59 = arith.constant dense<0.000000e+00> : vector<2xf32>
    %123 = vector.multi_reduction <add>, %122, %cst_59 [1] : vector<2x7xf32> to vector<2xf32>
    %124 = vector.shape_cast %123 : vector<2xf32> to vector<2x1xf32>
    %125 = arith.addf %124, %120 : vector<2x1xf32>
    %126 = arith.divf %120, %125 : vector<2x1xf32>
    %127 = math.log %126 : vector<2x1xf32>
    %cst_60 = arith.constant 0.000000e+00 : f32
    %128 = vector.broadcast %cst_60 : f32 to vector<2x1xf32>
    %129 = arith.subf %128, %127 : vector<2x1xf32>
    %cst_61 = arith.constant 0.000000e+00 : f32
    %130 = vector.broadcast %cst_61 : f32 to vector<2x87xf32>
    %131 = tpu.concatenate %118, %129, %97, %130 in 1 : vector<2x8xf32>, vector<2x1xf32>, vector<2x32xf32>, vector<2x87xf32> -> vector<2x128xf32>
    %c0_62 = arith.constant 0 : index
    %c0_63 = arith.constant 0 : index
    %132 = vector.load %arg8[%c0_62, %c0_63] : memref<2x128xf32, #tpu.memory_space<vmem>>, vector<2x128xf32>
    tpu.vector_store %arg8[%c0_62, %c0_63], %131 {strides = array<i32>} : memref<2x128xf32, #tpu.memory_space<vmem>>, vector<2x128xf32>,
    return
  }
}

</mosaic_0001>

<bundles_post_ra>
// kernel: page_ranker_forward.1
= control target key start
LH: loop header
LB: loop body
LE: loop exit
PB: predicated region body
PF: predicated region fallthrough
CT: control target
= control target key end

     0   :  { %v2304_v0 = vmov 0   ;;  %v2305_v6 = vmov 0.0   ;;  %v31_v12 = vlaneseq  ;;  %vm53_vm0 = vcmask 523264   ;;  %s2306_s25 = smov 32   ;;  %s2307_s30 = smov 64   ;;  %s2932_s0 = inlined_call_operand.vmem [shape: s32[16,1], index: 0, kind: input, shape index: {}]   ;;  %s2933_s1 = inlined_call_operand.vmem [shape: f32[64,32], index: 1, kind: input, shape index: {}]   ;;  %s2934_s2 = inlined_call_operand.vmem [shape: f32[4,128,32], index: 2, kind: input, shape index: {}]   ;;  %s2935_s3 = inlined_call_operand.vmem [shape: f32[4,1,32], index: 3, kind: input, shape index: {}]   ;;  %s2936_s4 = inlined_call_operand.vmem [shape: f32[32,32], index: 4, kind: input, shape index: {}]   ;;  %s2937_s7 = inlined_call_operand.vmem [shape: f32[2,8,32], index: 7, kind: input, shape index: {}]   ;;  %s2938_s5 = inlined_call_operand.vmem [shape: f32[1,32], index: 5, kind: input, shape index: {}]   ;;  %s2939_s6 = inlined_call_operand.vmem [shape: f32[2,32], index: 6, kind: input, shape index: {}]   ;;  %s2940_s8 = inlined_call_operand.vmem [shape: f32[2,128], index: 8, kind: output, shape index: {}]  }
   0x1   :  { %2283 = vset.pattern.permute.xlu0 %v2304_v0  ;;  %v29_v1 = vld [vmem:[%s2932_s0] sm:$0xff]  ;;  %v52_v2 = vld [vmem:[%s2933_s1 + $0x38] sm:$0xff]  ;;  %v51_v3 = vld [vmem:[%s2933_s1 + $0x30] sm:$0xff]  ;;  %2117 = vmatprep.subr.mxu1 %v2305_v6  ;;  %vm141_vm3 = vcmask 1041408   ;;  %vm150_vm4 = vcmask 1046528   ;;  %vm169_vm5 = vcmask 1045504  }
   0x2   :  { %34 = vperm.xlu0 %2283, %v29_v1   ;;  %2098 = vmatprep.subr.mxu0 %v52_v2  ;;  %v30_v4 = vld [vmem:[%s2932_s0 + $0x8] sm:$0xff]  ;;  %v49_v7 = vld [vmem:[%s2933_s1 + $0x20] sm:$0xff]  ;;  %v48_v8 = vld [vmem:[%s2933_s1 + $0x18] sm:$0xff]  ;;  %v2390_v13 = vand.u32 127, %v31_v12  ;;  %vm2308_vm6 = vmmov 0   ;;  %v2492_v57 = vshrl.u32 %v31_v12, 7 }
   0x3   :  { %2099 = vmatpush3.msra.mxu0 %v52_v2  ;;  %v50_v5 = vld [vmem:[%s2933_s1 + $0x28] sm:$0xff]  ;;  %v47_v9 = vld [vmem:[%s2933_s1 + $0x10] sm:$0xff]  ;;  %v45_v11 = vld [vmem:[%s2933_s1] sm:$0xff]  ;;  %2149 = vmatprep.mubr.msk.f32.mxu1 %vm2308_vm6, %v2305_v6  ;;  %v2309_v54 = vmov 1983009808   ;;  %vm188_vm7 = vcmask 261120  }
   0x4   :  { %2100 = vmatprep.subr.mxu0 %v51_v3  ;;  %v46_v10 = vld [vmem:[%s2933_s1 + $0x8] sm:$0xff]  ;;  %v269_v18 = vld [vmem:[%s2934_s2 + $0x78] sm:$0xff]  ;;  %v268_v19 = vld [vmem:[%s2934_s2 + $0x70] sm:$0xff]  ;;  %v208_v55 = vunpack.c.l.s4 %v2309_v54  ;;  %vm197_vm8 = vcmask 785408   ;;  %vm460_vm9 = vcmask 254976   ;;  %vm541_vm10 = vcmask 1043459  }
   0x5   :  { %2101 = vmatpush3.msra.mxu0 %v51_v3  ;;  %2118 = vmatpush3.msra.mxu1 %v269_v18  ;;  %v267_v20 = vld [vmem:[%s2934_s2 + $0x68] sm:$0xff]  ;;  %v266_v21 = vld [vmem:[%s2934_s2 + $0x60] sm:$0xff]  ;;  %v265_v22 = vld [vmem:[%s2934_s2 + $0x58] sm:$0xff]  ;;  %vm543_vm11 = vcmask 1044484   ;;  %vm545_vm12 = vcmask 1045509   ;;  %vm547_vm13 = vcmask 1046534  }
   0x6   :  { %37 = vperm.xlu0 %2283, %v30_v4   ;;  %2102 = vmatprep.subr.mxu0 %v50_v5  ;;  %v264_v23 = vld [vmem:[%s2934_s2 + $0x50] sm:$0xff]  ;;  %v263_v24 = vld [vmem:[%s2934_s2 + $0x48] sm:$0xff]  ;;  %v262_v25 = vld [vmem:[%s2934_s2 + $0x40] sm:$0xff]  ;;  %v209_v56 = vunpack.c.0.s8 %v208_v55  ;;  %vm1119_vm14 = vcmask 1044480   ;;  %vm1561_vm15 = vcmask 1043456  }
   0x7   :  { %2103 = vmatpush3.msra.mxu0 %v50_v5  ;;  %2119 = vmatprep.subr.mxu1 %v2305_v6  ;;  %v261_v26 = vld [vmem:[%s2934_s2 + $0x38] sm:$0xff]  ;;  %v260_v29 = vld [vmem:[%s2934_s2 + $0x30] sm:$0xff]  ;;  %v259_v34 = vld [vmem:[%s2934_s2 + $0x28] sm:$0xff] }
   0x8   :  { %2104 = vmatprep.subr.mxu0 %v49_v7  ;;  %2120 = vmatpush3.msra.mxu1 %v268_v19  ;;  %v258_v39 = vld [vmem:[%s2934_s2 + $0x20] sm:$0xff]  ;;  %v257_v43 = vld [vmem:[%s2934_s2 + $0x18] sm:$0xff]  ;;  %v256_v47 = vld [vmem:[%s2934_s2 + $0x10] sm:$0xff]  ;;  %v2495_v60 = vsub.s32 %v209_v56, %v2492_v57 }
   0x9   :  { %2105 = vmatpush3.msra.mxu0 %v49_v7  ;;  %2121 = vmatprep.subr.mxu1 %v2305_v6  ;;  %v255_v48 = vld [vmem:[%s2934_s2 + $0x8] sm:$0xff]  ;;  %v254_v52 = vld [vmem:[%s2934_s2] sm:$0xff] }
   0xa   :  { %2106 = vmatprep.subr.mxu0 %v48_v8  ;;  %2122 = vmatpush3.msra.mxu1 %v267_v20 }
   0xb   :  { %2107 = vmatpush3.msra.mxu0 %v48_v8  ;;  %2123 = vmatprep.subr.mxu1 %v2305_v6 }
   0xc   :  { %2108 = vmatprep.subr.mxu0 %v47_v9  ;;  %2124 = vmatpush3.msra.mxu1 %v266_v21 }
   0xd   :  { %2109 = vmatpush3.msra.mxu0 %v47_v9  ;;  %2125 = vmatprep.subr.mxu1 %v2305_v6 }
   0xe   :  { %2110 = vmatprep.subr.mxu0 %v46_v10  ;;  %2126 = vmatpush3.msra.mxu1 %v265_v22 }
   0xf   :  { %2111 = vmatpush3.msra.mxu0 %v46_v10  ;;  %2127 = vmatprep.subr.mxu1 %v2305_v6 }
  0x10   :  { %2112 = vmatprep.subr.mxu0 %v45_v11  ;;  %2128 = vmatpush3.msra.mxu1 %v264_v23 }
  0x11   :  { %2113 = vmatpush3.msra.mxu0 %v45_v11  ;;  %2129 = vmatprep.subr.mxu1 %v2305_v6 }
  0x12   :  { %2130 = vmatpush3.msra.mxu1 %v263_v24 }
  0x13   :  { %2131 = vmatprep.subr.mxu1 %v2305_v6 }
  0x14   :  { %2132 = vmatpush3.msra.mxu1 %v262_v25 }
  0x15   :  { %2133 = vmatprep.subr.mxu1 %v2305_v6 }
  0x16   :  { %2134 = vmatpush3.msra.mxu1 %v261_v26 }
  0x17   :  { %2135 = vmatprep.subr.mxu1 %v2305_v6 }
  0x18   :  { %2136 = vmatpush3.msra.mxu1 %v260_v29 }
  0x19   :  { %2137 = vmatprep.subr.mxu1 %v2305_v6 }
  0x1a   :  { %2138 = vmatpush3.msra.mxu1 %v259_v34 }
  0x1b   :  { %2139 = vmatprep.subr.mxu1 %v2305_v6 }
  0x1c   :  { %2140 = vmatpush3.msra.mxu1 %v258_v39 }
  0x1d   :  { %2141 = vmatprep.subr.mxu1 %v2305_v6 }
  0x1e   :  { %2142 = vmatpush3.msra.mxu1 %v257_v43  ;;  %v1950_v43 = vld [vmem:[%s2935_s3] ss:$0 sm:$0xff] }
  0x1f   :  { %2143 = vmatprep.subr.mxu1 %v2305_v6 }
  0x20   :  { %2144 = vmatpush3.msra.mxu1 %v256_v47 }
  0x21   :  { %2145 = vmatprep.subr.mxu1 %v2305_v6 }
  0x22   :  { %2146 = vmatpush3.msra.mxu1 %v255_v48 }
  0x23   :  { %2147 = vmatprep.subr.mxu1 %v2305_v6 }
  0x24   :  { %2148 = vmatpush3.msra.mxu1 %v254_v52 }
  0x7d   :  { %v35_v14 = vpop.permute.xlu0 %34 }
  0x7e   :  { %vm39_vm1 = vcmp.eq.s32.totalorder %v2390_v13, %v35_v14 }
  0x7f   :  { %v1946_v15 = vsel %vm39_vm1, 1.0, %v2305_v6  ;;  %vm1719_vm1 = vcmask 1041409  }
  0x80   :  { %2114 = vmatprep.mubr.msk.f32.mxu0 %vm53_vm0, %v1946_v15 }
  0x81   :  { %v38_v16 = vpop.permute.xlu0 %37 }
  0x82   :  { %vm40_vm2 = vcmp.eq.s32.totalorder %v2390_v13, %v38_v16 }
  0x83   :  { %v1947_v17 = vsel %vm40_vm2, 1.0, %v2305_v6  ;;  %vm1877_vm2 = vcmask 50176  }
  0x84   :  { %2115 = vmatmul.mubr.msk.f32.vlgmr.msra.gmra.mxu0 %vm53_vm0, %v1947_v17 }
 0x144   :  { %v2116_v27 = vpop.f32.mrf.mxu0 }
 0x145   :  { %v138_v28 = vrot.slane %v2116_v27, 6 }
 0x146   :  { %v126_v30 = vpop.f32.mrf.mxu0 }
 0x147   :  { %v2438_v31 = vsel %vm141_vm3, 0.0, %v138_v28  ;;  %v2441_v32 = vsel %vm141_vm3, %v138_v28, 0.0  ;;  %v137_v33 = vrot.slane %v126_v30, 6 }
 0x148   :  { %v154_v35 = vrot.slane %v2438_v31, 1  ;;  %v155_v36 = vrot.slane %v2441_v32, 1  ;;  %v173_v49 = vrot.slane %v2438_v31, 2  ;;  %v174_v50 = vrot.slane %v2441_v32, 2 }
 0x149   :  { %v142_v37 = vsel %vm141_vm3, 0.0, %v137_v33  ;;  %v2451_v38 = vsel %vm141_vm3, %v137_v33, 0.0 }
 0x14a   :  { %v151_v40 = vrot.slane %v142_v37, 1  ;;  %v152_v41 = vrot.slane %v2451_v38, 1  ;;  %v156_v42 = vsel %vm150_vm4, %v154_v35, %v155_v36  ;;  %v170_v44 = vrot.slane %v142_v37, 2 }
 0x14b   :  { %v171_v45 = vrot.slane %v2451_v38, 2  ;;  %161 = vrot.lane.b32.xlu0 %v156_v42, %s2306_s25  ;;  %v175_v53 = vsel %vm169_vm5, %v173_v49, %v174_v50  ;;  %v1965_v42 = vld [vmem:[%s2934_s2 + $0xf0] sm:$0xff] }
 0x14c   :  { %v153_v46 = vsel %vm150_vm4, %v151_v40, %v152_v41 }
 0x14d   :  { %157 = vrot.lane.b32.xlu1 %v153_v46, %s2306_s25  ;;  %v172_v51 = vsel %vm169_vm5, %v170_v44, %v171_v45 }
 0x14f   :  { %159 = vrot.lane.b32.xlu0 %v152_v41, %s2306_s25  ;;  %v1966_v41 = vld [vmem:[%s2934_s2 + $0xf8] sm:$0xff] }
 0x150   :  { %2158 = vmatprep.subr.mxu0 %v1966_v41 }
 0x151   :  { %176 = vrot.lane.b32.xlu1 %v172_v51, %s2307_s30  ;;  %2159 = vmatpush3.msra.mxu0 %v1966_v41 }
 0x152   :  { %2160 = vmatprep.subr.mxu0 %v1965_v42 }
 0x153   :  { %163 = vrot.lane.b32.xlu0 %v155_v36, %s2306_s25  ;;  %2161 = vmatpush3.msra.mxu0 %v1965_v42 }
 0x155   :  { %180 = vrot.lane.b32.xlu1 %v175_v53, %s2307_s30 }
 0x159   :  { %178 = vrot.lane.b32.xlu1 %v171_v45, %s2307_s30 }
 0x15d   :  { %182 = vrot.lane.b32.xlu1 %v174_v50, %s2307_s30 }
 0x1bd   :  { %v162_v59 = vpop.permute.xlu0 %161 }
 0x1be   :  { %v191_v4 = vsel %vm188_vm7, %v2438_v31, %v162_v59 }
 0x1bf   :  { %v158_v58 = vpop.permute.xlu1 %157 }
 0x1c0   :  { %v189_v61 = vsel %vm188_vm7, %v142_v37, %v158_v58 }
 0x1c1   :  { %v160_v1 = vpop.permute.xlu0 %159 }
 0x1c2   :  { %v190_v16 = vsel %vm188_vm7, %v2451_v38, %v160_v1 }
 0x1c3   :  { %v177_v62 = vpop.permute.xlu1 %176 }
 0x1c4   :  { %v193_v63 = vsel %vm53_vm0, %v189_v61, %v177_v62 }
 0x1c5   :  { %v198_v0 = vsel %vm197_vm8, %v193_v63, 0.0  ;;  %v164_v19 = vpop.permute.xlu0 %163 }
 0x1c6   :  { %v206_v2 = vcombine.high %v198_v0, %v198_v0  ;;  %v213_v3 = vrot.slane %v198_v0, %v2495_v60  ;;  %v192_v28 = vsel %vm188_vm7, %v2441_v32, %v164_v19 }
 0x1c7   :  { %v181_v5 = vpop.permute.xlu1 %180 }
 0x1c8   :  { %v220_v7 = vrot.slane %v206_v2, %v2495_v60  ;;  %v221_v8 = vcombine.high %v213_v3, %v213_v3  ;;  %v195_v9 = vsel %vm53_vm0, %v191_v4, %v181_v5 }
 0x1c9   :  { %v200_v10 = vsel %vm197_vm8, %v195_v9, 0.0 }
 0x1ca   :  { %v222_v11 = vcombine.high %v220_v7, %v220_v7  ;;  %v277_v12 = vcombine.low %v213_v3, %v221_v8  ;;  %v230_v14 = vcombine.high %v200_v10, %v200_v10  ;;  %v237_v15 = vrot.slane %v200_v10, %v2495_v60 }
 0x1cb   :  { %v179_v17 = vpop.permute.xlu1 %178 }
 0x1cc   :  { %v278_v18 = vcombine.low %v220_v7, %v222_v11  ;;  %v244_v20 = vrot.slane %v230_v14, %v2495_v60  ;;  %v245_v21 = vcombine.high %v237_v15, %v237_v15  ;;  %v194_v22 = vsel %vm53_vm0, %v190_v16, %v179_v17 }
 0x1cd   :  { %v199_v23 = vsel %vm197_vm8, %v194_v22, 0.0  ;;  %v285_v26 = vrot.slane %v277_v12, %v2495_v60 }
 0x1ce   :  { %v295_v24 = vcombine.low %v245_v21, %v244_v20  ;;  %v229_v25 = vrot.slane %v199_v23, %v2495_v60  ;;  %v292_v27 = vrot.slane %v278_v18, %v2495_v60  ;;  %v246_v35 = vcombine.high %v244_v20, %v244_v20 }
 0x1cf   :  { %v183_v29 = vpop.permute.xlu1 %182 }
 0x1d0   :  { %v294_v30 = vcombine.low %v229_v25, %v237_v15  ;;  %v196_v31 = vsel %vm53_vm0, %v192_v28, %v183_v29  ;;  %v293_v33 = vcombine.low %v285_v26, %v292_v27  ;;  %v309_v38 = vrot.slane %v295_v24, %v2495_v60 }
 0x1d1   :  { %v201_v34 = vsel %vm197_vm8, %v196_v31, 0.0 }
 0x1d2   :  { %v253_v36 = vrot.slane %v201_v34, %v2495_v60  ;;  %2150 = vmatmul.mubr.f32.vlgmr.msra.gmra.mxu1 %v293_v33  ;;  %v302_v37 = vrot.slane %v294_v30, %v2495_v60 }
 0x1d3   :  { %2152 = vmatprep.mubr.msk.f32.mxu1 %vm2308_vm6, %v2305_v6 }
 0x1d4   :  { %v311_v39 = vcombine.low %v246_v35, %v253_v36  ;;  %v310_v32 = vcombine.low %v302_v37, %v309_v38 }
 0x1d6   :  { %2153 = vmatmul.mubr.f32.gmra.mxu1 %v310_v32  ;;  %v318_v40 = vrot.slane %v311_v39, %v2495_v60 }
 0x1d7   :  { %2155 = vmatprep.mubr.msk.f32.mxu1 %vm2308_vm6, %v2305_v6 }
 0x1da   :  { %2156 = vmatmul.mubr.f32.gmra.mxu1 %v318_v40 }
 0x292   :  { %v388_v44 = vpop.f32.mrf.mxu1 }
 0x293   :  { %v389_v45 = vadd.f32 %v1950_v43, %v388_v44  ;;  %v1963_v44 = vld [vmem:[%s2934_s2 + $0xe0] sm:$0xff] }
 0x294   :  { %v2151_v46 = vpop.f32.mrf.mxu1 }
 0x295   :  { %v402_v47 = vmax.f32 %v389_v45, 0.0 }
 0x296   :  { %v393_v48 = vpop.f32.mrf.mxu1 }
 0x297   :  { %v408_v49 = vcombine.high %v402_v47, %v402_v47  ;;  %v415_v50 = vrot.slane %v402_v47, %v2495_v60  ;;  %v394_v51 = vadd.f32 %v1950_v43, %v393_v48 }
 0x298   :  { %v2154_v52 = vpop.f32.mrf.mxu1 }
 0x299   :  { %v422_v53 = vrot.slane %v408_v49, %v2495_v60  ;;  %v423_v54 = vcombine.high %v415_v50, %v415_v50  ;;  %v461_v55 = vsel %vm460_vm9, %v415_v50, -inf  ;;  %v403_v56 = vmax.f32 %v394_v51, 0.0 }
 0x29a   :  { %v462_v58 = vrot.slane %v461_v55, 4  ;;  %v398_v59 = vpop.f32.mrf.mxu1 }
 0x29b   :  { %v424_v61 = vcombine.high %v422_v53, %v422_v53  ;;  %v468_v62 = vsel %vm460_vm9, %v423_v54, -inf  ;;  %v475_v63 = vsel %vm460_vm9, %v422_v53, -inf  ;;  %v425_v0 = vcombine.high %v403_v56, %v403_v56 }
 0x29c   :  { %v463_v1 = vmax.f32 %v461_v55, %v462_v58  ;;  %v469_v2 = vrot.slane %v468_v62, 4  ;;  %v476_v3 = vrot.slane %v475_v63, 4  ;;  %v432_v4 = vrot.slane %v403_v56, %v2495_v60  ;;  %v2157_v5 = vpop.f32.mrf.mxu1 }
 0x29d   :  { %v482_v7 = vsel %vm460_vm9, %v424_v61, -inf  ;;  %v439_v8 = vrot.slane %v425_v0, %v2495_v60  ;;  %v399_v9 = vadd.f32 %v1950_v43, %v398_v59  ;;  %v1964_v43 = vld [vmem:[%s2934_s2 + $0xe8] sm:$0xff] }
 0x29e   :  { %v464_v10 = vrot.slane %v463_v1, 2  ;;  %v470_v11 = vmax.f32 %v468_v62, %v469_v2  ;;  %v477_v12 = vmax.f32 %v475_v63, %v476_v3  ;;  %v483_v14 = vrot.slane %v482_v7, 4  ;;  %2162 = vmatprep.subr.mxu0 %v1964_v43 }
 0x29f   :  { %v440_v15 = vcombine.high %v432_v4, %v432_v4  ;;  %v441_v16 = vcombine.high %v439_v8, %v439_v8  ;;  %v489_v17 = vsel %vm460_vm9, %v432_v4, -inf  ;;  %v503_v18 = vsel %vm460_vm9, %v439_v8, -inf  ;;  %2163 = vmatpush3.msra.mxu0 %v1964_v43  ;;  %v1956_v43 = vld [vmem:[%s2934_s2 + $0xa8] sm:$0xff] }
 0x2a0   :  { %v465_v19 = vmax.f32 %v463_v1, %v464_v10  ;;  %v471_v20 = vrot.slane %v470_v11, 2  ;;  %v478_v21 = vrot.slane %v477_v12, 2  ;;  %v484_v22 = vmax.f32 %v482_v7, %v483_v14  ;;  %2164 = vmatprep.subr.mxu0 %v1963_v44 }
 0x2a1   :  { %v490_v23 = vrot.slane %v489_v17, 4  ;;  %v496_v24 = vsel %vm460_vm9, %v440_v15, -inf  ;;  %v504_v25 = vrot.slane %v503_v18, 4  ;;  %v510_v26 = vsel %vm460_vm9, %v441_v16, -inf  ;;  %2165 = vmatpush3.msra.mxu0 %v1963_v44  ;;  %v1955_v44 = vld [vmem:[%s2934_s2 + $0xa0] sm:$0xff] }
 0x2a2   :  { %v466_v27 = vrot.slane %v465_v19, 1  ;;  %v472_v28 = vmax.f32 %v470_v11, %v471_v20  ;;  %v479_v29 = vmax.f32 %v477_v12, %v478_v21  ;;  %v485_v30 = vrot.slane %v484_v22, 2 }
 0x2a3   :  { %v491_v31 = vmax.f32 %v489_v17, %v490_v23  ;;  %v497_v33 = vrot.slane %v496_v24, 4  ;;  %v505_v34 = vmax.f32 %v503_v18, %v504_v25  ;;  %v511_v35 = vrot.slane %v510_v26, 4 }
 0x2a4   :  { %v467_v36 = vmax.f32 %v465_v19, %v466_v27  ;;  %v473_v37 = vrot.slane %v472_v28, 1  ;;  %v480_v38 = vrot.slane %v479_v29, 1  ;;  %v486_v39 = vmax.f32 %v484_v22, %v485_v30  ;;  %v1962_v22 = vld [vmem:[%s2934_s2 + $0xd8] sm:$0xff] }
 0x2a5   :  { %v492_v32 = vrot.slane %v491_v31, 2  ;;  %v498_v40 = vmax.f32 %v496_v24, %v497_v33  ;;  %v506_v41 = vrot.slane %v505_v34, 2  ;;  %v512_v42 = vmax.f32 %v510_v26, %v511_v35  ;;  %2166 = vmatprep.subr.mxu0 %v1962_v22  ;;  %v1961_v26 = vld [vmem:[%s2934_s2 + $0xd0] sm:$0xff]  ;;  %v1959_v35 = vld [vmem:[%s2934_s2 + $0xc0] sm:$0xff] }
 0x2a6   :  { %v474_v45 = vmax.f32 %v472_v28, %v473_v37  ;;  %v481_v46 = vmax.f32 %v479_v29, %v480_v38  ;;  %v487_v47 = vrot.slane %v486_v39, 1  ;;  %v404_v48 = vmax.f32 %v399_v9, 0.0  ;;  %2167 = vmatpush3.msra.mxu0 %v1962_v22  ;;  %v1958_v38 = vld [vmem:[%s2934_s2 + $0xb8] sm:$0xff] }
 0x2a7   :  { %v493_v49 = vmax.f32 %v491_v31, %v492_v32  ;;  %v499_v50 = vrot.slane %v498_v40, 2  ;;  %v507_v51 = vmax.f32 %v505_v34, %v506_v41  ;;  %v513_v52 = vrot.slane %v512_v42, 2  ;;  %2168 = vmatprep.subr.mxu0 %v1961_v26  ;;  %v1960_v31 = vld [vmem:[%s2934_s2 + $0xc8] sm:$0xff] }
 0x2a8   :  { %v488_v53 = vmax.f32 %v486_v39, %v487_v47  ;;  %v542_v54 = vsel %vm541_vm10, %v474_v45, %v467_v36  ;;  %v448_v55 = vrot.slane %v404_v48, %v2495_v60  ;;  %v571_v21 = vrot.slane %v2305_v6, 2  ;;  %2169 = vmatpush3.msra.mxu0 %v1961_v26  ;;  %v1953_v47 = vld [vmem:[%s2934_s2 + $0x90] sm:$0xff]  ;;  %v1952_v48 = vld [vmem:[%s2934_s2 + $0x88] sm:$0xff] }
 0x2a9   :  { %v494_v56 = vrot.slane %v493_v49, 1  ;;  %v500_v58 = vmax.f32 %v498_v40, %v499_v50  ;;  %v514_v59 = vmax.f32 %v512_v42, %v513_v52  ;;  %v508_v61 = vrot.slane %v507_v51, 1  ;;  %2170 = vmatprep.subr.mxu0 %v1960_v31  ;;  %v1957_v40 = vld [vmem:[%s2934_s2 + $0xb0] sm:$0xff] }
 0x2aa   :  { %v449_v62 = vcombine.high %v448_v55, %v448_v55  ;;  %v517_v63 = vsel %vm460_vm9, %v448_v55, -inf  ;;  %v544_v0 = vsel %vm543_vm11, %v481_v46, %v542_v54  ;;  %2171 = vmatpush3.msra.mxu0 %v1960_v31  ;;  %v1954_v46 = vld [vmem:[%s2934_s2 + $0x98] sm:$0xff]  ;;  %v2310_v50 = vmov 1966171168  }
 0x2ab   :  { %v495_v1 = vmax.f32 %v493_v49, %v494_v56  ;;  %v501_v2 = vrot.slane %v500_v58, 1  ;;  %v518_v3 = vrot.slane %v517_v63, 4  ;;  %v546_v60 = vsel %vm545_vm12, %v488_v53, %v544_v0  ;;  %2172 = vmatprep.subr.mxu0 %v1959_v35  ;;  %v1951_v49 = vld [vmem:[%s2934_s2 + $0x80] sm:$0xff] }
 0x2ac   :  { %v524_v4 = vsel %vm460_vm9, %v449_v62, -inf  ;;  %v515_v5 = vrot.slane %v514_v59, 1  ;;  %v509_v10 = vmax.f32 %v507_v51, %v508_v61  ;;  %2173 = vmatpush3.msra.mxu0 %v1959_v35  ;;  %v591_v51 = vunpack.c.l.s4 %v2310_v50  ;;  %v1984_v50 = vld [vmem:[%s2934_s2 + $0x168] sm:$0xff] }
 0x2ad   :  { %v525_v7 = vrot.slane %v524_v4, 4  ;;  %v548_v8 = vsel %vm547_vm13, %v495_v1, %v546_v60  ;;  %v502_v9 = vmax.f32 %v500_v58, %v501_v2  ;;  %v519_v11 = vmax.f32 %v517_v63, %v518_v3  ;;  %2174 = vmatprep.subr.mxu0 %v1958_v38 }
 0x2ae   :  { %v555_v12 = vsel %vm141_vm3, 0.0, %v548_v8  ;;  %v516_v18 = vmax.f32 %v514_v59, %v515_v5  ;;  %2175 = vmatpush3.msra.mxu0 %v1958_v38  ;;  %v592_v52 = vunpack.c.0.s8 %v591_v51  ;;  %v1968_v51 = vld [vmem:[%s2935_s3 + $0x1] ss:$0 sm:$0xff] }
 0x2af   :  { %v526_v14 = vmax.f32 %v524_v4, %v525_v7  ;;  %v2563_v15 = vsel %vm150_vm4, %v555_v12, 0.0  ;;  %v520_v16 = vrot.slane %v519_v11, 2  ;;  %v549_v24 = vsel %vm541_vm10, %v509_v10, %v502_v9  ;;  %2176 = vmatprep.subr.mxu0 %v1957_v40 }
 0x2b0   :  { %v561_v17 = vrot.slane %v2563_v15, 1  ;;  %v570_v20 = vrot.slane %v2563_v15, 2  ;;  %v550_v30 = vsel %vm543_vm11, %v516_v18, %v549_v24  ;;  %2177 = vmatpush3.msra.mxu0 %v1957_v40  ;;  %v2618_v54 = vsub.s32 %v592_v52, %v2492_v57 }
 0x2b1   :  { %v527_v19 = vrot.slane %v526_v14, 2  ;;  %v521_v23 = vmax.f32 %v519_v11, %v520_v16  ;;  %2178 = vmatprep.subr.mxu0 %v1956_v43 }
 0x2b2   :  { %563 = vrot.lane.b32.xlu0 %v561_v17, %s2306_s25  ;;  %v572_v29 = vsel %vm169_vm5, %v570_v20, %v571_v21  ;;  %2179 = vmatpush3.msra.mxu0 %v1956_v43 }
 0x2b3   :  { %v528_v25 = vmax.f32 %v526_v14, %v527_v19  ;;  %v522_v27 = vrot.slane %v521_v23, 1  ;;  %2180 = vmatprep.subr.mxu0 %v1955_v44 }
 0x2b4   :  { %2181 = vmatpush3.msra.mxu0 %v1955_v44 }
 0x2b5   :  { %v529_v28 = vrot.slane %v528_v25, 1  ;;  %v523_v33 = vmax.f32 %v521_v23, %v522_v27  ;;  %2182 = vmatprep.subr.mxu0 %v1954_v46 }
 0x2b6   :  { %575 = vrot.lane.b32.xlu0 %v572_v29, %s2307_s30  ;;  %2183 = vmatpush3.msra.mxu0 %v1954_v46 }
 0x2b7   :  { %v530_v34 = vmax.f32 %v528_v25, %v529_v28  ;;  %v551_v36 = vsel %vm545_vm12, %v523_v33, %v550_v30  ;;  %2184 = vmatprep.subr.mxu0 %v1953_v47 }
 0x2b8   :  { %2185 = vmatpush3.msra.mxu0 %v1953_v47 }
 0x2b9   :  { %v552_v37 = vsel %vm547_vm13, %v530_v34, %v551_v36  ;;  %2186 = vmatprep.subr.mxu0 %v1952_v48 }
 0x2ba   :  { %v556_v39 = vsel %vm141_vm3, 0.0, %v552_v37  ;;  %2187 = vmatpush3.msra.mxu0 %v1952_v48  ;;  %v1986_v48 = vld [vmem:[%s2934_s2 + $0x178] sm:$0xff] }
 0x2bb   :  { %v558_v32 = vsel %vm150_vm4, %v556_v39, 0.0  ;;  %2188 = vmatprep.subr.mxu0 %v1951_v49  ;;  %2193 = vmatprep.subr.mxu1 %v1986_v48  ;;  %vm1937_vm4 = vcmask 72704  }
 0x2bc   :  { %v562_v41 = vrot.slane %v558_v32, 1  ;;  %v573_v42 = vrot.slane %v558_v32, 2  ;;  %2189 = vmatpush3.msra.mxu0 %v1951_v49  ;;  %v1985_v49 = vld [vmem:[%s2934_s2 + $0x170] sm:$0xff]  ;;  %2194 = vmatpush3.msra.mxu1 %v1986_v48 }
 0x2bd   :  { %2228 = vmatprep.subr.mxu0 %v2305_v6  ;;  %2195 = vmatprep.subr.mxu1 %v1985_v49 }
 0x2be   :  { %565 = vrot.lane.b32.xlu1 %v562_v41, %s2306_s25  ;;  %v574_v45 = vsel %vm169_vm5, %v573_v42, %v571_v21  ;;  %2196 = vmatpush3.msra.mxu1 %v1985_v49  ;;  %vm1939_vm5 = vcmask 334848  }
 0x2bf   :  { %2197 = vmatprep.subr.mxu1 %v1984_v50 }
 0x2c0   :  { %2198 = vmatpush3.msra.mxu1 %v1984_v50 }
 0x2c2   :  { %577 = vrot.lane.b32.xlu1 %v574_v45, %s2307_s30 }
 0x324   :  { %v564_v53 = vpop.permute.xlu0 %563 }
 0x325   :  { %v581_v55 = vsel %vm188_vm7, %v2563_v15, %v564_v53 }
 0x328   :  { %v576_v56 = vpop.permute.xlu0 %575 }
 0x329   :  { %v583_v58 = vsel %vm53_vm0, %v581_v55, %v576_v56 }
 0x32a   :  { %v585_v59 = vsel %vm197_vm8, %v583_v58, 0.0 }
 0x32b   :  { %v589_v61 = vcombine.high %v585_v59, %v585_v59  ;;  %v596_v62 = vrot.slane %v585_v59, %v2618_v54 }
 0x32d   :  { %v603_v63 = vrot.slane %v589_v61, %v2618_v54  ;;  %v604_v0 = vcombine.high %v596_v62, %v596_v62  ;;  %v612_v4 = vrot.slane %v596_v62, %v2618_v54 }
 0x32f   :  { %v605_v1 = vcombine.high %v603_v63, %v603_v63  ;;  %v626_v3 = vrot.slane %v604_v0, %v2618_v54  ;;  %v619_v60 = vrot.slane %v603_v63, %v2618_v54 }
 0x330   :  { %v566_v2 = vpop.permute.xlu1 %565 }
 0x331   :  { %v633_v5 = vrot.slane %v605_v1, %v2618_v54  ;;  %v582_v7 = vsel %vm188_vm7, %v558_v32, %v566_v2  ;;  %v710_v10 = vcombine.low %v612_v4, %v626_v3  ;;  %v1969_v11 = vcombine.high %v612_v4, %v626_v3 }
 0x332   :  { %v635_v17 = vcombine.high %v619_v60, %v619_v60 }
 0x333   :  { %v712_v16 = vcombine.low %v619_v60, %v633_v5  ;;  %v720_v21 = vrot.slane %v710_v10, %v2618_v54  ;;  %v727_v22 = vrot.slane %v1969_v11, %v2618_v54 }
 0x334   :  { %v578_v8 = vpop.permute.xlu1 %577 }
 0x335   :  { %v584_v9 = vsel %vm53_vm0, %v582_v7, %v578_v8  ;;  %v734_v28 = vrot.slane %v712_v16, %v2618_v54  ;;  %v742_v35 = vcombine.low %v720_v21, %v727_v22 }
 0x336   :  { %v586_v12 = vsel %vm197_vm8, %v584_v9, 0.0 }
 0x337   :  { %v637_v14 = vcombine.high %v586_v12, %v586_v12  ;;  %v644_v15 = vrot.slane %v586_v12, %v2618_v54  ;;  %v750_v41 = vrot.slane %v742_v35, %v2618_v54 }
 0x339   :  { %v651_v18 = vrot.slane %v637_v14, %v2618_v54  ;;  %v652_v19 = vcombine.high %v644_v15, %v644_v15  ;;  %v660_v20 = vrot.slane %v644_v15, %v2618_v54 }
 0x33b   :  { %v653_v23 = vcombine.high %v651_v18, %v651_v18  ;;  %v667_v24 = vrot.slane %v651_v18, %v2618_v54  ;;  %v674_v25 = vrot.slane %v652_v19, %v2618_v54  ;;  %v682_v26 = vcombine.high %v660_v20, %v660_v20 }
 0x33c   :  { %v713_v27 = vcombine.low %v635_v17, %v660_v20 }
 0x33d   :  { %v681_v29 = vrot.slane %v653_v23, %v2618_v54  ;;  %v683_v30 = vcombine.high %v667_v24, %v667_v24  ;;  %v684_v31 = vcombine.high %v674_v25, %v674_v25  ;;  %v759_v33 = vcombine.low %v674_v25, %v682_v26 }
 0x33e   :  { %v741_v34 = vrot.slane %v713_v27, %v2618_v54 }
 0x33f   :  { %v760_v36 = vcombine.low %v684_v31, %v667_v24  ;;  %v761_v37 = vcombine.low %v681_v29, %v683_v30  ;;  %v768_v39 = vrot.slane %v759_v33, %v2618_v54 }
 0x340   :  { %v743_v38 = vcombine.low %v734_v28, %v741_v34 }
 0x341   :  { %v775_v32 = vrot.slane %v760_v36, %v2618_v54  ;;  %v782_v40 = vrot.slane %v761_v37, %v2618_v54 }
 0x342   :  { %v757_v42 = vrot.slane %v743_v38, %v2618_v54 }
 0x343   :  { %v783_v43 = vcombine.low %v768_v39, %v775_v32  ;;  %v797_v46 = vrot.slane %v782_v40, %v2618_v54 }
 0x344   :  { %v758_v44 = vcombine.low %v750_v41, %v757_v42 }
 0x345   :  { %v790_v45 = vrot.slane %v783_v43, %v2618_v54 }
 0x346   :  { %2190 = vmatprep.mubr.f32.mxu0 %v758_v44 }
 0x347   :  { %v798_v47 = vcombine.low %v790_v45, %v797_v46 }
 0x349   :  { %2191 = vmatmul.mubr.f32.vlgmr.msra.gmra.mxu0 %v798_v47 }
 0x34a   :  { %2260 = vmatprep.mubr.msk.f32.mxu0 %vm2308_vm6, %v2305_v6 }
 0x409   :  { %v2192_v52 = vpop.f32.mrf.mxu0 }
 0x40a   :  { %v873_v53 = vadd.f32 %v2192_v52, %v1968_v51 }
 0x40b   :  { %v867_v55 = vpop.f32.mrf.mxu0 }
 0x40c   :  { %v877_v56 = vmax.f32 %v873_v53, 0.0  ;;  %v868_v58 = vadd.f32 %v1968_v51, %v867_v55 }
 0x40e   :  { %v928_v59 = vcombine.high %v877_v56, %v877_v56  ;;  %v935_v61 = vrot.slane %v877_v56, %v2618_v54  ;;  %v876_v62 = vmax.f32 %v868_v58, 0.0 }
 0x410   :  { %v942_v63 = vrot.slane %v928_v59, %v2618_v54  ;;  %v943_v0 = vcombine.high %v935_v61, %v935_v61  ;;  %v950_v1 = vrot.slane %v935_v61, %v2618_v54  ;;  %v880_v2 = vcombine.high %v876_v62, %v876_v62 }
 0x411   :  { %v887_v3 = vrot.slane %v876_v62, %v2618_v54  ;;  %v1983_v62 = vld [vmem:[%s2934_s2 + $0x160] sm:$0xff] }
 0x412   :  { %v964_v4 = vrot.slane %v943_v0, %v2618_v54  ;;  %v965_v60 = vcombine.high %v950_v1, %v950_v1  ;;  %v894_v5 = vrot.slane %v880_v2, %v2618_v54  ;;  %v957_v8 = vrot.slane %v942_v63, %v2618_v54  ;;  %v1982_v63 = vld [vmem:[%s2934_s2 + $0x158] sm:$0xff]  ;;  %2199 = vmatprep.subr.mxu1 %v1983_v62 }
 0x413   :  { %v895_v7 = vcombine.high %v887_v3, %v887_v3  ;;  %v903_v12 = vrot.slane %v887_v3, %v2618_v54  ;;  %2200 = vmatpush3.msra.mxu1 %v1983_v62 }
 0x414   :  { %v966_v9 = vcombine.high %v964_v4, %v964_v4  ;;  %v1027_v10 = vcombine.low %v964_v4, %v965_v60  ;;  %v896_v11 = vcombine.high %v894_v5, %v894_v5  ;;  %v910_v17 = vrot.slane %v894_v5, %v2618_v54  ;;  %2201 = vmatprep.subr.mxu1 %v1982_v63 }
 0x415   :  { %v917_v14 = vrot.slane %v895_v7, %v2618_v54  ;;  %2202 = vmatpush3.msra.mxu1 %v1982_v63 }
 0x416   :  { %v1034_v15 = vrot.slane %v1027_v10, %v2618_v54  ;;  %v1042_v16 = vcombine.low %v966_v9, %v957_v8  ;;  %v924_v18 = vrot.slane %v896_v11, %v2618_v54  ;;  %v1981_v10 = vld [vmem:[%s2934_s2 + $0x150] sm:$0xff] }
 0x417   :  { %v967_v19 = vcombine.low %v903_v12, %v917_v14  ;;  %v1970_v20 = vcombine.high %v903_v12, %v917_v14  ;;  %2203 = vmatprep.subr.mxu1 %v1981_v10 }
 0x418   :  { %v1041_v21 = vrot.slane %v1034_v15, %v2618_v54  ;;  %v1049_v22 = vrot.slane %v1042_v16, %v2618_v54  ;;  %v927_v23 = vcombine.high %v924_v18, %v924_v18  ;;  %v997_v24 = vcombine.low %v910_v17, %v924_v18  ;;  %2204 = vmatpush3.msra.mxu1 %v1981_v10  ;;  %v1980_v17 = vld [vmem:[%s2934_s2 + $0x148] sm:$0xff] }
 0x419   :  { %v974_v25 = vrot.slane %v967_v19, %v2618_v54  ;;  %v989_v26 = vrot.slane %v1970_v20, %v2618_v54  ;;  %2205 = vmatprep.subr.mxu1 %v1980_v17 }
 0x41a   :  { %v1056_v27 = vrot.slane %v1049_v22, %v2618_v54  ;;  %v1091_v28 = vsel %vm460_vm9, %v1041_v21, -inf  ;;  %v1004_v29 = vrot.slane %v997_v24, %v2618_v54  ;;  %v1012_v30 = vcombine.low %v927_v23, %v950_v1  ;;  %2206 = vmatpush3.msra.mxu1 %v1980_v17  ;;  %v1979_v22 = vld [vmem:[%s2934_s2 + $0x140] sm:$0xff] }
 0x41b   :  { %v1092_v31 = vrot.slane %v1091_v28, 4  ;;  %v981_v33 = vrot.slane %v974_v25, %v2618_v54  ;;  %v996_v34 = vrot.slane %v989_v26, %v2618_v54  ;;  %2207 = vmatprep.subr.mxu1 %v1979_v22 }
 0x41c   :  { %v1098_v35 = vsel %vm460_vm9, %v1056_v27, -inf  ;;  %v1011_v36 = vrot.slane %v1004_v29, %v2618_v54  ;;  %v1019_v37 = vrot.slane %v1012_v30, %v2618_v54  ;;  %2208 = vmatpush3.msra.mxu1 %v1979_v22  ;;  %v1978_v27 = vld [vmem:[%s2934_s2 + $0x138] sm:$0xff] }
 0x41d   :  { %v1093_v38 = vmax.f32 %v1091_v28, %v1092_v31  ;;  %v1099_v39 = vrot.slane %v1098_v35, 4  ;;  %v1063_v32 = vsel %vm460_vm9, %v981_v33, -inf  ;;  %v1070_v40 = vsel %vm460_vm9, %v996_v34, -inf  ;;  %2209 = vmatprep.subr.mxu1 %v1978_v27  ;;  %v1977_v31 = vld [vmem:[%s2934_s2 + $0x130] sm:$0xff] }
 0x41e   :  { %v1026_v41 = vrot.slane %v1019_v37, %v2618_v54  ;;  %v1064_v42 = vrot.slane %v1063_v32, 4  ;;  %v1071_v43 = vrot.slane %v1070_v40, 4  ;;  %v1077_v44 = vsel %vm460_vm9, %v1011_v36, -inf  ;;  %2210 = vmatpush3.msra.mxu1 %v1978_v27  ;;  %v1975_v37 = vld [vmem:[%s2934_s2 + $0x120] sm:$0xff] }
 0x41f   :  { %v1094_v45 = vrot.slane %v1093_v38, 2  ;;  %v1100_v46 = vmax.f32 %v1098_v35, %v1099_v39  ;;  %v1078_v47 = vrot.slane %v1077_v44, 4  ;;  %2211 = vmatprep.subr.mxu1 %v1977_v31  ;;  %v1976_v35 = vld [vmem:[%s2934_s2 + $0x128] sm:$0xff]  ;;  %v1974_v39 = vld [vmem:[%s2934_s2 + $0x118] sm:$0xff]  ;;  %v2003_v27 = vld [vmem:[%s2934_s2 + $0x1e0] sm:$0xff] }
 0x420   :  { %v1065_v48 = vmax.f32 %v1063_v32, %v1064_v42  ;;  %v1072_v49 = vmax.f32 %v1070_v40, %v1071_v43  ;;  %v1084_v50 = vsel %vm460_vm9, %v1026_v41, -inf  ;;  %2212 = vmatpush3.msra.mxu1 %v1977_v31  ;;  %v1973_v32 = vld [vmem:[%s2934_s2 + $0x110] sm:$0xff]  ;;  %v1972_v40 = vld [vmem:[%s2934_s2 + $0x108] sm:$0xff]  ;;  %v1971_v41 = vld [vmem:[%s2934_s2 + $0x100] sm:$0xff] }
 0x421   :  { %v1079_v51 = vmax.f32 %v1077_v44, %v1078_v47  ;;  %v1085_v52 = vrot.slane %v1084_v50, 4  ;;  %v1101_v53 = vrot.slane %v1100_v46, 2  ;;  %v1095_v61 = vmax.f32 %v1093_v38, %v1094_v45  ;;  %2213 = vmatprep.subr.mxu1 %v1976_v35  ;;  %v1999_v31 = vld [vmem:[%s2934_s2 + $0x1c0] sm:$0xff] }
 0x422   :  { %v1066_v55 = vrot.slane %v1065_v48, 2  ;;  %v1073_v56 = vrot.slane %v1072_v49, 2  ;;  %2214 = vmatpush3.msra.mxu1 %v1976_v35  ;;  %v1988_v35 = vld [vmem:[%s2935_s3 + $0x2] ss:$0 sm:$0xff] }
 0x423   :  { %v1080_v58 = vrot.slane %v1079_v51, 2  ;;  %v1086_v59 = vmax.f32 %v1084_v50, %v1085_v52  ;;  %v1102_v2 = vmax.f32 %v1100_v46, %v1101_v53  ;;  %v1096_v9 = vrot.slane %v1095_v61, 1  ;;  %2215 = vmatprep.subr.mxu1 %v1975_v37 }
 0x424   :  { %v1067_v0 = vmax.f32 %v1065_v48, %v1066_v55  ;;  %v1074_v1 = vmax.f32 %v1072_v49, %v1073_v56  ;;  %2216 = vmatpush3.msra.mxu1 %v1975_v37 }
 0x425   :  { %v1081_v3 = vmax.f32 %v1079_v51, %v1080_v58  ;;  %v1087_v4 = vrot.slane %v1086_v59, 2  ;;  %v1103_v14 = vrot.slane %v1102_v2, 1  ;;  %v1097_v21 = vmax.f32 %v1095_v61, %v1096_v9  ;;  %2217 = vmatprep.subr.mxu1 %v1974_v39 }
 0x426   :  { %v1068_v60 = vrot.slane %v1067_v0, 1  ;;  %v1075_v5 = vrot.slane %v1074_v1, 1  ;;  %2218 = vmatpush3.msra.mxu1 %v1974_v39 }
 0x427   :  { %v1082_v7 = vrot.slane %v1081_v3, 1  ;;  %v1088_v8 = vmax.f32 %v1086_v59, %v1087_v4  ;;  %v1104_v24 = vmax.f32 %v1102_v2, %v1103_v14  ;;  %2219 = vmatprep.subr.mxu1 %v1973_v32 }
 0x428   :  { %v1069_v11 = vmax.f32 %v1067_v0, %v1068_v60  ;;  %v1076_v12 = vmax.f32 %v1074_v1, %v1075_v5  ;;  %2220 = vmatpush3.msra.mxu1 %v1973_v32 }
 0x429   :  { %v1083_v15 = vmax.f32 %v1081_v3, %v1082_v7  ;;  %v1089_v16 = vrot.slane %v1088_v8, 1  ;;  %2221 = vmatprep.subr.mxu1 %v1972_v40 }
 0x42a   :  { %v1111_v18 = vsel %vm541_vm10, %v1076_v12, %v1069_v11  ;;  %2222 = vmatpush3.msra.mxu1 %v1972_v40 }
 0x42b   :  { %v1112_v19 = vsel %vm543_vm11, %v1083_v15, %v1111_v18  ;;  %v1090_v20 = vmax.f32 %v1088_v8, %v1089_v16  ;;  %2223 = vmatprep.subr.mxu1 %v1971_v41 }
 0x42c   :  { %v1117_v23 = vsel %vm141_vm3, 0.0, %v1112_v19  ;;  %2224 = vmatpush3.msra.mxu1 %v1971_v41 }
 0x42d   :  { %v1120_v25 = vsel %vm1119_vm14, %v1117_v23, 0.0  ;;  %v1113_v26 = vsel %vm541_vm10, %v1097_v21, %v1090_v20  ;;  %2263 = vmatprep.subr.mxu1 %v2305_v6 }
 0x42e   :  { %v1124_v28 = vrot.slane %v1120_v25, 1  ;;  %v1114_v29 = vsel %vm543_vm11, %v1104_v24, %v1113_v26  ;;  %v1132_v36 = vrot.slane %v1120_v25, 2  ;;  %v2006_v24 = vld [vmem:[%s2934_s2 + $0x1f8] sm:$0xff]  ;;  %v2004_v26 = vld [vmem:[%s2934_s2 + $0x1e8] sm:$0xff] }
 0x42f   :  { %v1118_v30 = vsel %vm141_vm3, 0.0, %v1114_v29  ;;  %2229 = vmatpush3.msra.mxu0 %v2006_v24  ;;  %v2001_v29 = vld [vmem:[%s2934_s2 + $0x1d0] sm:$0xff] }
 0x430   :  { %1126 = vrot.lane.b32.xlu0 %v1124_v28, %s2306_s25  ;;  %v1121_v33 = vsel %vm1119_vm14, %v1118_v30, 0.0  ;;  %2230 = vmatprep.subr.mxu0 %v2305_v6  ;;  %v2002_v28 = vld [vmem:[%s2934_s2 + $0x1d8] sm:$0xff]  ;;  %v2000_v30 = vld [vmem:[%s2934_s2 + $0x1c8] sm:$0xff] }
 0x431   :  { %v1125_v34 = vrot.slane %v1121_v33, 1  ;;  %v1133_v38 = vrot.slane %v1121_v33, 2 }
 0x433   :  { %1128 = vrot.lane.b32.xlu1 %v1125_v34, %s2306_s25  ;;  %v1997_v34 = vld [vmem:[%s2934_s2 + $0x1b0] sm:$0xff] }
 0x434   :  { %1134 = vrot.lane.b32.xlu0 %v1132_v36, %s2307_s30 }
 0x437   :  { %1136 = vrot.lane.b32.xlu1 %v1133_v38, %s2307_s30 }
 0x4a2   :  { %v1127_v42 = vpop.permute.xlu0 %1126 }
 0x4a3   :  { %v1140_v44 = vsel %vm188_vm7, %v1120_v25, %v1127_v42  ;;  %v2005_v25 = vld [vmem:[%s2934_s2 + $0x1f0] sm:$0xff] }
 0x4a4   :  { %2231 = vmatpush3.msra.mxu0 %v2005_v25 }
 0x4a5   :  { %v1129_v43 = vpop.permute.xlu1 %1128  ;;  %2232 = vmatprep.subr.mxu0 %v2305_v6 }
 0x4a6   :  { %v1135_v45 = vpop.permute.xlu0 %1134  ;;  %v1141_v48 = vsel %vm188_vm7, %v1121_v33, %v1129_v43  ;;  %2233 = vmatpush3.msra.mxu0 %v2004_v26  ;;  %v1998_v33 = vld [vmem:[%s2934_s2 + $0x1b8] sm:$0xff] }
 0x4a7   :  { %v1142_v46 = vsel %vm53_vm0, %v1140_v44, %v1135_v45  ;;  %2234 = vmatprep.subr.mxu0 %v2305_v6 }
 0x4a8   :  { %v1144_v47 = vsel %vm197_vm8, %v1142_v46, 0.0  ;;  %2235 = vmatpush3.msra.mxu0 %v2003_v27 }
 0x4a9   :  { %v1148_v49 = vcombine.high %v1144_v47, %v1144_v47  ;;  %v1155_v50 = vrot.slane %v1144_v47, %v2618_v54  ;;  %v1137_v51 = vpop.permute.xlu1 %1136  ;;  %2236 = vmatprep.subr.mxu0 %v2305_v6 }
 0x4aa   :  { %v1143_v52 = vsel %vm53_vm0, %v1141_v48, %v1137_v51  ;;  %2237 = vmatpush3.msra.mxu0 %v2002_v28 }
 0x4ab   :  { %v1162_v53 = vrot.slane %v1148_v49, %v2618_v54  ;;  %v1163_v55 = vcombine.high %v1155_v50, %v1155_v50  ;;  %v1145_v56 = vsel %vm197_vm8, %v1143_v52, 0.0  ;;  %v1170_v61 = vrot.slane %v1155_v50, %v2618_v54  ;;  %2238 = vmatprep.subr.mxu0 %v2305_v6 }
 0x4ac   :  { %v1187_v58 = vcombine.high %v1145_v56, %v1145_v56  ;;  %v1194_v59 = vrot.slane %v1145_v56, %v2618_v54  ;;  %2239 = vmatpush3.msra.mxu0 %v2001_v29  ;;  %v1994_v29 = vld [vmem:[%s2934_s2 + $0x198] sm:$0xff] }
 0x4ad   :  { %v1177_v62 = vrot.slane %v1162_v53, %v2618_v54  ;;  %v1184_v63 = vrot.slane %v1163_v55, %v2618_v54  ;;  %2240 = vmatprep.subr.mxu0 %v2305_v6 }
 0x4ae   :  { %v1201_v0 = vrot.slane %v1187_v58, %v2618_v54  ;;  %v1202_v1 = vcombine.high %v1194_v59, %v1194_v59  ;;  %v1209_v2 = vrot.slane %v1194_v59, %v2618_v54  ;;  %2241 = vmatpush3.msra.mxu0 %v2000_v30  ;;  %v1993_v30 = vld [vmem:[%s2934_s2 + $0x190] sm:$0xff] }
 0x4af   :  { %v1251_v3 = vcombine.low %v1170_v61, %v1184_v63  ;;  %v1989_v4 = vcombine.high %v1170_v61, %v1184_v63  ;;  %2242 = vmatprep.subr.mxu0 %v2305_v6 }
 0x4b0   :  { %v1223_v60 = vrot.slane %v1202_v1, %v2618_v54  ;;  %v1224_v5 = vcombine.high %v1209_v2, %v1209_v2  ;;  %v1253_v7 = vcombine.low %v1177_v62, %v1209_v2  ;;  %v1216_v10 = vrot.slane %v1201_v0, %v2618_v54  ;;  %2243 = vmatpush3.msra.mxu0 %v1999_v31 }
 0x4b1   :  { %v1261_v8 = vrot.slane %v1251_v3, %v2618_v54  ;;  %v1268_v9 = vrot.slane %v1989_v4, %v2618_v54  ;;  %2244 = vmatprep.subr.mxu0 %v2305_v6 }
 0x4b2   :  { %v1225_v11 = vcombine.high %v1223_v60, %v1223_v60  ;;  %v1254_v12 = vcombine.low %v1223_v60, %v1224_v5  ;;  %v1275_v14 = vrot.slane %v1253_v7, %v2618_v54  ;;  %2245 = vmatpush3.msra.mxu0 %v1998_v33 }
 0x4b3   :  { %v1283_v17 = vcombine.low %v1261_v8, %v1268_v9  ;;  %2246 = vmatprep.subr.mxu0 %v2305_v6 }
 0x4b4   :  { %v1300_v15 = vcombine.low %v1225_v11, %v1216_v10  ;;  %v1282_v16 = vrot.slane %v1254_v12, %v2618_v54  ;;  %2247 = vmatpush3.msra.mxu0 %v1997_v34 }
 0x4b5   :  { %v1291_v20 = vrot.slane %v1283_v17, %v2618_v54  ;;  %2248 = vmatprep.subr.mxu0 %v2305_v6 }
 0x4b6   :  { %v1284_v18 = vcombine.low %v1275_v14, %v1282_v16  ;;  %v1307_v19 = vrot.slane %v1300_v15, %v2618_v54 }
 0x4b8   :  { %v1298_v21 = vrot.slane %v1284_v18, %v2618_v54  ;;  %v1314_v23 = vrot.slane %v1307_v19, %v2618_v54  ;;  %v1996_v19 = vld [vmem:[%s2934_s2 + $0x1a8] sm:$0xff] }
 0x4b9   :  { %2249 = vmatpush3.msra.mxu0 %v1996_v19 }
 0x4ba   :  { %v1299_v22 = vcombine.low %v1291_v20, %v1298_v21  ;;  %v1995_v20 = vld [vmem:[%s2934_s2 + $0x1a0] sm:$0xff]  ;;  %2250 = vmatprep.subr.mxu0 %v2305_v6 }
 0x4bb   :  { %2251 = vmatpush3.msra.mxu0 %v1995_v20 }
 0x4bc   :  { %2225 = vmatprep.mubr.f32.mxu1 %v1299_v22  ;;  %2252 = vmatprep.subr.mxu0 %v2305_v6 }
 0x4bd   :  { %2226 = vmatmul.mubr.f32.vlgmr.msra.gmra.mxu1 %v1314_v23  ;;  %2253 = vmatpush3.msra.mxu0 %v1994_v29 }
 0x4be   :  { %2271 = vmatprep.mubr.msk.f32.mxu1 %vm2308_vm6, %v2305_v6  ;;  %2254 = vmatprep.subr.mxu0 %v2305_v6 }
 0x4bf   :  { %2255 = vmatpush3.msra.mxu0 %v1993_v30 }
 0x4c0   :  { %2256 = vmatprep.subr.mxu0 %v2305_v6 }
 0x57d   :  { %v2227_v36 = vpop.f32.mrf.mxu1 }
 0x57e   :  { %v1389_v37 = vadd.f32 %v2227_v36, %v1988_v35 }
 0x57f   :  { %v1383_v38 = vpop.f32.mrf.mxu1 }
 0x580   :  { %v1384_v39 = vadd.f32 %v1988_v35, %v1383_v38  ;;  %v1393_v40 = vmax.f32 %v1389_v37, 0.0 }
 0x582   :  { %v1392_v32 = vmax.f32 %v1384_v39, 0.0  ;;  %v1451_v45 = vrot.slane %v1393_v40, %v2618_v54  ;;  %v1992_v39 = vld [vmem:[%s2934_s2 + $0x188] sm:$0xff] }
 0x583   :  { %2257 = vmatpush3.msra.mxu0 %v1992_v39 }
 0x584   :  { %v1396_v41 = vcombine.high %v1392_v32, %v1392_v32  ;;  %v1403_v42 = vrot.slane %v1392_v32, %v2618_v54  ;;  %v1458_v55 = vrot.slane %v1451_v45, %v2618_v54  ;;  %2258 = vmatprep.subr.mxu0 %v2305_v6 }
 0x586   :  { %v1410_v43 = vrot.slane %v1396_v41, %v2618_v54  ;;  %v1411_v44 = vcombine.high %v1403_v42, %v1403_v42  ;;  %v1419_v47 = vrot.slane %v1403_v42, %v2618_v54  ;;  %v1991_v42 = vld [vmem:[%s2934_s2 + $0x180] sm:$0xff] }
 0x587   :  { %2259 = vmatpush3.msra.mxu0 %v1991_v42 }
 0x588   :  { %v1412_v46 = vcombine.high %v1410_v43, %v1410_v43  ;;  %v1426_v48 = vrot.slane %v1410_v43, %v2618_v54  ;;  %v1433_v49 = vrot.slane %v1411_v44, %v2618_v54 }
 0x58a   :  { %v1440_v50 = vrot.slane %v1412_v46, %v2618_v54  ;;  %v1442_v51 = vcombine.high %v1426_v48, %v1426_v48  ;;  %v1459_v52 = vcombine.low %v1419_v47, %v1433_v49  ;;  %v1990_v53 = vcombine.high %v1419_v47, %v1433_v49 }
 0x58c   :  { %v1444_v56 = vcombine.high %v1440_v50, %v1440_v50  ;;  %v1466_v58 = vrot.slane %v1459_v52, %v2618_v54  ;;  %v1481_v59 = vrot.slane %v1990_v53, %v2618_v54  ;;  %v1489_v61 = vcombine.low %v1440_v50, %v1442_v51 }
 0x58e   :  { %v1473_v62 = vrot.slane %v1466_v58, %v2618_v54  ;;  %v1488_v63 = vrot.slane %v1481_v59, %v2618_v54  ;;  %v1496_v0 = vrot.slane %v1489_v61, %v2618_v54  ;;  %v1504_v1 = vcombine.low %v1444_v56, %v1458_v55 }
 0x590   :  { %v1503_v2 = vrot.slane %v1496_v0, %v2618_v54  ;;  %v1511_v3 = vrot.slane %v1504_v1, %v2618_v54  ;;  %v1523_v4 = vsel %vm460_vm9, %v1473_v62, -inf  ;;  %v1530_v60 = vsel %vm460_vm9, %v1488_v63, -inf  ;;  %v1709_v0 = vld [vmem:[%s2936_s4 + $0x18] sm:$0xff]  ;;  %v1708_v1 = vld [vmem:[%s2936_s4 + $0x10] sm:$0xff] }
 0x591   :  { %v1524_v5 = vrot.slane %v1523_v4, 4  ;;  %v1531_v7 = vrot.slane %v1530_v60, 4  ;;  %2264 = vmatpush3.msra.mxu1 %v1709_v0 }
 0x592   :  { %v1518_v8 = vrot.slane %v1511_v3, %v2618_v54  ;;  %v1537_v9 = vsel %vm460_vm9, %v1503_v2, -inf  ;;  %2265 = vmatprep.subr.mxu1 %v2305_v6  ;;  %v1707_v2 = vld [vmem:[%s2936_s4 + $0x8] sm:$0xff]  ;;  %v1706_v3 = vld [vmem:[%s2936_s4] sm:$0xff] }
 0x593   :  { %v1525_v10 = vmax.f32 %v1523_v4, %v1524_v5  ;;  %v1532_v11 = vmax.f32 %v1530_v60, %v1531_v7  ;;  %v1538_v12 = vrot.slane %v1537_v9, 4  ;;  %2266 = vmatpush3.msra.mxu1 %v1708_v1  ;;  %v2008_v4 = vld [vmem:[%s2935_s3 + $0x3] ss:$0 sm:$0xff] }
 0x594   :  { %v1544_v14 = vsel %vm460_vm9, %v1518_v8, -inf  ;;  %2267 = vmatprep.subr.mxu1 %v2305_v6 }
 0x595   :  { %v1526_v15 = vrot.slane %v1525_v10, 2  ;;  %v1533_v16 = vrot.slane %v1532_v11, 2  ;;  %v1539_v17 = vmax.f32 %v1537_v9, %v1538_v12  ;;  %v1545_v18 = vrot.slane %v1544_v14, 4  ;;  %2268 = vmatpush3.msra.mxu1 %v1707_v2 }
 0x596   :  { %2269 = vmatprep.subr.mxu1 %v2305_v6 }
 0x597   :  { %v1527_v21 = vmax.f32 %v1525_v10, %v1526_v15  ;;  %v1534_v22 = vmax.f32 %v1532_v11, %v1533_v16  ;;  %v1540_v23 = vrot.slane %v1539_v17, 2  ;;  %v1546_v24 = vmax.f32 %v1544_v14, %v1545_v18  ;;  %2270 = vmatpush3.msra.mxu1 %v1706_v3 }
 0x599   :  { %v1528_v25 = vrot.slane %v1527_v21, 1  ;;  %v1535_v26 = vrot.slane %v1534_v22, 1  ;;  %v1541_v27 = vmax.f32 %v1539_v17, %v1540_v23  ;;  %v1547_v28 = vrot.slane %v1546_v24, 2 }
 0x59b   :  { %v1529_v31 = vmax.f32 %v1527_v21, %v1528_v25  ;;  %v1536_v33 = vmax.f32 %v1534_v22, %v1535_v26  ;;  %v1542_v34 = vrot.slane %v1541_v27, 1  ;;  %v1548_v35 = vmax.f32 %v1546_v24, %v1547_v28  ;;  %v1796_v25 = vld [vmem:[%s2937_s7] sm:$0xff] }
 0x59c   :  { %v1805_v26 = vmul.f32 %v1796_v25, %v1796_v25  ;;  %v2009_v28 = vld [vmem:[%s2938_s5] ss:$0 sm:$0xff]  ;;  %s2311_s5 = smov 8  }
 0x59d   :  { %v1555_v36 = vsel %vm541_vm10, %v1536_v33, %v1529_v31  ;;  %v1549_v37 = vrot.slane %v1548_v35, 1  ;;  %v1543_v40 = vmax.f32 %v1541_v27, %v1542_v34  ;;  %v1794_v33 = vld [vmem:[%s2939_s6] sm:$0x3]  ;;  %s2312_s6 = smov 9  }
 0x59e   :  { %v1559_v38 = vsel %vm141_vm3, 0.0, %v1555_v36  ;;  %v1807_v27 = vsel %vm188_vm7, %v1805_v26, 0.0 }
 0x59f   :  { %v1562_v32 = vsel %vm1561_vm15, %v1559_v38, 0.0  ;;  %v1550_v41 = vmax.f32 %v1548_v35, %v1549_v37  ;;  %v1797_v35 = vld [vmem:[%s2937_s7 + $0x8] sm:$0xff] }
 0x5a0   :  { %v1566_v43 = vrot.slane %v1562_v32, 1  ;;  %v1574_v47 = vrot.slane %v1562_v32, 2  ;;  %v1806_v38 = vmul.f32 %v1797_v35, %v1797_v35 }
 0x5a1   :  { %v1556_v44 = vsel %vm541_vm10, %v1550_v41, %v1543_v40 }
 0x5a2   :  { %1568 = vrot.lane.b32.xlu0 %v1566_v43, %s2306_s25  ;;  %v1560_v45 = vsel %vm141_vm3, 0.0, %v1556_v44  ;;  %vm1935_vm3 = vcmask 64512  }
 0x5a3   :  { %v1563_v46 = vsel %vm1561_vm15, %v1560_v45, 0.0 }
 0x5a4   :  { %v1567_v48 = vrot.slane %v1563_v46, 1  ;;  %v1575_v49 = vrot.slane %v1563_v46, 2 }
 0x5a6   :  { %1576 = vrot.lane.b32.xlu0 %v1574_v47, %s2307_s30  ;;  %1570 = vrot.lane.b32.xlu1 %v1567_v48, %s2306_s25 }
 0x5aa   :  { %1578 = vrot.lane.b32.xlu1 %v1575_v49, %s2307_s30 }
 0x5ce   :  { %1808 = vadd.xlane.f32.xlu1 %v1807_v27 }
 0x614   :  { %v1569_v50 = vpop.permute.xlu0 %1568 }
 0x615   :  { %v1582_v53 = vsel %vm188_vm7, %v1562_v32, %v1569_v50  ;;  %v1810_v32 = vsel %vm188_vm7, %v1806_v38, 0.0  ;;  %v1844_v50 = vsub.s32 0, %v2492_v57 }
 0x618   :  { %v1577_v51 = vpop.permute.xlu0 %1576  ;;  %v1571_v52 = vpop.permute.xlu1 %1570 }
 0x619   :  { %v1584_v55 = vsel %vm53_vm0, %v1582_v53, %v1577_v51  ;;  %v1583_v56 = vsel %vm188_vm7, %v1563_v46, %v1571_v52 }
 0x61a   :  { %v1586_v61 = vsel %vm197_vm8, %v1584_v55, 0.0 }
 0x61c   :  { %v1579_v58 = vpop.permute.xlu1 %1578 }
 0x61d   :  { %v1585_v59 = vsel %vm53_vm0, %v1583_v56, %v1579_v58  ;;  %vm1691_vm0 = vcmask 257024  }
 0x61e   :  { %v1587_v62 = vsel %vm197_vm8, %v1585_v59, 0.0 }
 0x61f   :  { %v1615_v63 = vcombine.low %v1586_v61, %v1587_v62 }
 0x621   :  { %2261 = vmatmul.mubr.f32.vlgmr.msra.gmra.mxu0 %v1615_v63 }
 0x657   :  { %v1809_v40 = vpop.xlane.xlu1 %1808 }
 0x658   :  { %v1813_v43 = vmax.f32 %v1809_v40, 1e-16 }
 0x6e1   :  { %v1683_v60 = vpop.f32.mrf.mxu0 }
 0x6e2   :  { %v1684_v5 = vadd.f32 %v2008_v4, %v1683_v60 }
 0x6e3   :  { %v2262_v7 = vpop.f32.mrf.mxu0 }
 0x6e4   :  { %v1687_v8 = vmax.f32 %v1684_v5, 0.0  ;;  %v1866_v5 = vadd.s32 1, %v2390_v13 }
 0x6e6   :  { %v1689_v9 = vcombine.high %v1687_v8, %v1687_v8  ;;  %v1692_v10 = vsel %vm1691_vm0, %v1687_v8, -inf  ;;  %v1869_v7 = vsub.s32 %v1866_v5, %v2492_v57 }
 0x6e7   :  { %v1693_v11 = vrot.slane %v1692_v10, 4 }
 0x6e8   :  { %v1699_v12 = vsel %vm1691_vm0, %v1689_v9, -inf }
 0x6e9   :  { %v1694_v14 = vmax.f32 %v1692_v10, %v1693_v11  ;;  %v1700_v15 = vrot.slane %v1699_v12, 4 }
 0x6eb   :  { %v1695_v16 = vrot.slane %v1694_v14, 2  ;;  %v1701_v17 = vmax.f32 %v1699_v12, %v1700_v15  ;;  %v1895_v15 = vsub.s32 1, %v2492_v57 }
 0x6ed   :  { %v1696_v18 = vmax.f32 %v1694_v14, %v1695_v16  ;;  %v1702_v6 = vrot.slane %v1701_v17, 2 }
 0x6ef   :  { %v1697_v19 = vrot.slane %v1696_v18, 1  ;;  %v1703_v20 = vmax.f32 %v1701_v17, %v1702_v6 }
 0x6f1   :  { %v1704_v21 = vrot.slane %v1703_v20, 1  ;;  %v1698_v22 = vmax.f32 %v1696_v18, %v1697_v19 }
 0x6f3   :  { %v1705_v23 = vmax.f32 %v1703_v20, %v1704_v21 }
 0x6f5   :  { %v1720_v24 = vsel %vm1719_vm1, %v1705_v23, %v1698_v22 }
 0x6f6   :  { %2272 = vmatmul.mubr.msk.f32.vlgmr.msra.gmra.mxu1 %vm188_vm7, %v1720_v24 }
 0x7b6   :  { %v1789_v29 = vpop.f32.mrf.mxu1 }
 0x7b7   :  { %v1790_v30 = vadd.f32 %v2009_v28, %v1789_v29 }
 0x7b8   :  { %v2273_v31 = vpop.f32.mrf.mxu1 }
 0x7b9   :  { %2284 = vtanh.f32 %v1790_v30 }
 0x7c6   :  { %v2285_v34 = vpop.eup %2284 }
 0x7c7   :  { %v2906_v36 = vmul.f32 %v2285_v34, %v1794_v33 }
 0x7c9   :  { %v1798_v37 = vmul.f32 %v2906_v36, %v2906_v36 }
 0x7cb   :  { %v1799_v39 = vsel %vm460_vm9, %v1798_v37, 0.0 }
 0x7cc   :  { %1800 = vadd.xlane.f32.xlu0 %v1799_v39 }
 0x7d0   :  { %1811 = vadd.xlane.f32.xlu0 %v1810_v32 }
 0x855   :  { %v1801_v41 = vpop.xlane.xlu0 %1800 }
 0x856   :  { %v1802_v42 = vmax.f32 %v1801_v41, 1e-16 }
 0x858   :  { %2286 = vrsqrt.f32 %v1802_v42 }
 0x859   :  { %v1812_v44 = vpop.xlane.xlu0 %1811  ;;  %2288 = vrsqrt.f32 %v1813_v43 }
 0x85a   :  { %v1814_v45 = vmax.f32 %v1812_v44, 1e-16 }
 0x85c   :  { %2290 = vrsqrt.f32 %v1814_v45 }
 0x865   :  { %v2287_v46 = vpop.eup %2286 }
 0x866   :  { %v1804_v47 = vmul.f32 %v2287_v46, %v2906_v36  ;;  %v2289_v48 = vpop.eup %2288 }
 0x867   :  { %v1817_v52 = vmul.f32 %v2289_v48, %v1796_v25 }
 0x868   :  { %v1826_v49 = vrot.slane %v1804_v47, %v2618_v54 }
 0x869   :  { %v2291_v51 = vpop.eup %2290 }
 0x86a   :  { %v1834_v53 = vrot.slane %v1826_v49, %v2618_v54  ;;  %v1827_v55 = vcombine.high %v1826_v49, %v1826_v49  ;;  %v1818_v58 = vmul.f32 %v2291_v51, %v1797_v35  ;;  %v1916_v35 = vsub.s32 %v2390_v13, %v2492_v57 }
 0x86c   :  { %v1845_v56 = vrot.slane %v1834_v53, %v1844_v50  ;;  %v1841_v59 = vrot.slane %v1827_v55, %v2618_v54 }
 0x86e   :  { %v1852_v61 = vmul.f32 %v1845_v56, %v1817_v52  ;;  %v1849_v62 = vrot.slane %v1841_v59, %v1844_v50 }
 0x870   :  { %v1854_v63 = vsel %vm188_vm7, %v1852_v61, 0.0  ;;  %v1853_v0 = vmul.f32 %v1849_v62, %v1818_v58 }
 0x871   :  { %1855 = vadd.xlane.f32.xlu0 %v1854_v63 }
 0x872   :  { %v1857_v1 = vsel %vm188_vm7, %v1853_v0, 0.0 }
 0x873   :  { %1858 = vadd.xlane.f32.xlu1 %v1857_v1 }
 0x8fa   :  { %v1856_v2 = vpop.xlane.xlu0 %1855 }
 0x8fb   :  { %v1860_v3 = vmul.f32 1.442695, %v1856_v2  ;;  %v1917_v39 = vrot.slane %v1856_v2, %v1916_v35 }
 0x8fc   :  { %v1859_v4 = vpop.xlane.xlu1 %1858 }
 0x8fd   :  { %2292 = vpow2.f32 %v1860_v3  ;;  %v1862_v60 = vmul.f32 1.442695, %v1859_v4  ;;  %v1921_v37 = vrot.slane %v1859_v4, %v1916_v35 }
 0x8ff   :  { %2294 = vpow2.f32 %v1862_v60  ;;  %v1922_v32 = vsel %vm1719_vm1, %v1921_v37, %v1917_v39 }
 0x90a   :  { %v2293_v54 = vpop.eup %2292 }
 0x90b   :  { %v1870_v9 = vrot.slane %v2293_v54, %v1869_v7 }
 0x90c   :  { %v2295_v8 = vpop.eup %2294 }
 0x90d   :  { %v1874_v10 = vrot.slane %v2295_v8, %v1869_v7  ;;  %v1881_v14 = vrot.slane %v2295_v8, 7 }
 0x90f   :  { %v1875_v11 = vsel %vm1719_vm1, %v1874_v10, %v1870_v9  ;;  %v1882_v16 = vsel %vm1719_vm1, %v1881_v14, %v2293_v54 }
 0x910   :  { %v1878_v12 = vsel %vm1877_vm2, %v1875_v11, 0.0 }
 0x911   :  { %1879 = vadd.xlane.f32.xlu0 %v1878_v12 }
 0x99a   :  { %v1880_v17 = vpop.xlane.xlu0 %1879 }
 0x99b   :  { %v1884_v18 = vadd.f32 %v1882_v16, %v1880_v17 }
 0x99d   :  { %v1896_v6 = vrot.slane %v1884_v18, %v1895_v15  ;;  %v1889_v19 = vrot.slane %v1884_v18, %v1844_v50 }
 0x99f   :  { %1898 = vbcast.lane.b32.xlu1 %v1896_v6, 256  ;;  %1891 = vbcast.lane.b32.xlu0 %v1889_v19, 256 }
 0xa11   :  { %v1899_v20 = vpop.permute.xlu1 %1898  ;;  %v1892_v21 = vpop.permute.xlu0 %1891 }
 0xa12   :  { %2296 = vrcp.f32 %v1899_v20 }
 0xa13   :  { %2298 = vrcp.f32 %v1892_v21 }
 0xa1f   :  { %v2297_v22 = vpop.eup %2296 }
 0xa20   :  { %v2299_v23 = vpop.eup %2298  ;;  %v1905_v24 = vmul.f32 %v2297_v22, %v2295_v8 }
 0xa21   :  { %v1903_v25 = vmul.f32 %v2299_v23, %v2293_v54 }
 0xa22   :  { %2300 = vlog2.f32 %v1905_v24 }
 0xa23   :  { %2302 = vlog2.f32 %v1903_v25 }
 0xa2f   :  { %v2301_v26 = vpop.eup %2300 }
 0xa30   :  { %v2303_v27 = vpop.eup %2302  ;;  %v1909_v28 = vmul.f32 0.6931472, %v2301_v26 }
 0xa31   :  { %v1907_v29 = vmul.f32 0.6931472, %v2303_v27 }
 0xa32   :  { %v1911_v30 = vsub.f32 0.0, %v1909_v28 }
 0xa33   :  { %v1910_v31 = vsub.f32 0.0, %v1907_v29 }
 0xa34   :  { %v1926_v33 = vrot.slane %v1911_v30, 7 }
 0xa36   :  { %v1927_v34 = vsel %vm1719_vm1, %v1926_v33, %v1910_v31 }
 0xa37   :  { %1928 = vrot.lane.b32.xlu1 %v1927_v34, %s2311_s5 }
 0xa3b   :  { %1932 = vrot.lane.b32.xlu1 %v2906_v36, %s2312_s6 }
 0xaa9   :  { %v1929_v38 = vpop.permute.xlu1 %1928 }
 0xaaa   :  { %v1936_v40 = vsel %vm1935_vm3, %v1922_v32, %v1929_v38 }
 0xaad   :  { %v1933_v41 = vpop.permute.xlu1 %1932 }
 0xaae   :  { %v1938_v42 = vsel %vm1937_vm4, %v1936_v40, %v1933_v41 }
 0xaaf   :  { %v1940_v43 = vsel %vm1939_vm5, %v1938_v42, 0.0 }
 0xab0   :  { %1941 = vst [vmem:[%s2940_s8] sm:$0x3] %v1940_v43 }

</bundles_post_ra>
